<compile_context>
chip_gen: v5e
topology: v5e:2x2
jax: 0.10.0
libtpu: 0.0.40
codegen_flags: <defaults>
</compile_context>

<pallas_src>
import functools

import jax
import jax.numpy as jnp
from jax import lax
from jax.experimental import pallas as pl
from jax.experimental.pallas import tpu as pltpu


def _round_up(x, m):
    return ((x + m - 1) // m) * m


def _value_mlp_kernel(fps_ref, w1_ref, b1_ref, w2_ref, b2_ref, w3_ref, b3_ref,
                      out_ref, *, compute_dtype):
    """Whole MLP for one batch tile: 2x (linear + ReLU), lane-dense head, softplus."""
    # In-kernel cast (no wrapper-side astype pass over fps); no-op for the f32 path.
    x = fps_ref[...].astype(compute_dtype)                     # (TB, fp_dim)

    # Layer 1: Linear(fp_dim -> latent) + ReLU.  (Dropout == identity at eval.)
    h = jnp.dot(x, w1_ref[...], preferred_element_type=jnp.float32) + b1_ref[...]
    h = jnp.maximum(h, 0.0)

    # Layer 2: Linear(latent -> latent) + ReLU.
    h = jnp.dot(h.astype(w2_ref.dtype), w2_ref[...],
                preferred_element_type=jnp.float32) + b2_ref[...]
    h = jnp.maximum(h, 0.0)                                     # (TB, latent) f32

    # Head Linear(latent -> 1), produced directly in lane-dense (1, TB) layout:
    # contract w3_row (1, latent) against h (TB, latent) over the latent axis on the
    # MXU (NT matmul).  Avoids the (TB,1)->(1,TB) relayout of the old epilogue.
    y = lax.dot_general(w3_ref[...], h,
                        dimension_numbers=(((1,), (1,)), ((), ())),
                        preferred_element_type=jnp.float32)     # (1, TB)
    y = y + b3_ref[0, 0]                                        # scalar bias from SMEM

    # softplus in the overflow-safe form, on the lane-dense (1, TB) result.
    out_ref[...] = (jnp.maximum(y, 0.0)
                    + jnp.log(1.0 + jnp.exp(-jnp.abs(y)))).astype(out_ref.dtype)

    # TODO(synk): training-mode Dropout (stochastic masking) not implemented;
    # eval semantics (identity) are used here.


@functools.partial(jax.jit, static_argnames=("block_b", "compute_dtype"))
def value_mlp_forward(fps, w1, b1, w2, b2, w3, b3, *, block_b=512,
                      compute_dtype=jnp.bfloat16):
    """fps: (B, fp_dim); weights stored (in_dim, out_dim); returns (B, 1) float32."""
    B, fp_dim = fps.shape
    latent = w1.shape[1]

    # Lane-dense output blocks need block_b to be a multiple of 128.  Cap block_b so
    # that (when B allows it) the grid has >= 2 steps, letting v7x's two TensorCores
    # both get work; on v5e/v6e (1 TC) this cap only trims wasted ragged-tail work.
    block_b = max(128, _round_up(block_b, 128))
    block_b = min(block_b, max(128, _round_up(pl.cdiv(B, 2), 128)))
    nb = pl.cdiv(B, block_b)
    Bp = nb * block_b

    # Resident weights in the MXU compute dtype (tiny one-time cast); biases and the
    # head row stay f32.  fps is intentionally NOT padded or pre-cast: the ragged
    # tail block reads out-of-bounds rows whose (garbage) results land only in
    # output columns >= B, which are sliced off below.
    w1_c = w1.astype(compute_dtype)
    w2_c = w2.astype(compute_dtype)
    b1_r = b1.reshape(1, latent).astype(jnp.float32)
    b2_r = b2.reshape(1, latent).astype(jnp.float32)
    w3_row = w3.reshape(1, latent).astype(jnp.float32)     # head weight as a row
    b3_s = b3.reshape(1, 1).astype(jnp.float32)            # scalar bias -> SMEM

    kernel = functools.partial(_value_mlp_kernel, compute_dtype=compute_dtype)

    out = pl.pallas_call(
        kernel,
        out_shape=jax.ShapeDtypeStruct((1, Bp), jnp.float32),
        grid_spec=pltpu.PrefetchScalarGridSpec(
            num_scalar_prefetch=0,
            grid=(nb,),
            in_specs=[
                pl.BlockSpec((block_b, fp_dim), lambda i: (i, 0)),   # fps tile (streamed)
                pl.BlockSpec((fp_dim, latent), lambda i: (0, 0)),    # W1 (resident)
                pl.BlockSpec((1, latent), lambda i: (0, 0)),         # b1
                pl.BlockSpec((latent, latent), lambda i: (0, 0)),    # W2
                pl.BlockSpec((1, latent), lambda i: (0, 0)),         # b2
                pl.BlockSpec((1, latent), lambda i: (0, 0)),         # w3 row (head)
                pl.BlockSpec(memory_space=pltpu.MemorySpace.SMEM),   # b3 scalar
            ],
            out_specs=pl.BlockSpec((1, block_b), lambda i: (0, i)),  # lane-dense slab
        ),
        compiler_params=pltpu.CompilerParams(
            dimension_semantics=("parallel",)),
    )(fps, w1_c, b1_r, w2_c, b2_r, w3_row, b3_s)

    return out.reshape(Bp, 1)[:B]


def init_params(key, fp_dim, latent_dim, n_layers):
    """Deterministic synthetic parameters. Stored as (in_dim, out_dim)."""
    assert n_layers == 2, "this script instantiates n_layers=2 (1 extra hidden layer)"
    k1, k2, k3, k4, k5, k6 = jax.random.split(key, 6)
    scale = 0.05
    w1 = scale * jax.random.normal(k1, (fp_dim, latent_dim), jnp.float32)
    b1 = 0.01 * jax.random.normal(k4, (1, latent_dim), jnp.float32)
    w2 = scale * jax.random.normal(k2, (latent_dim, latent_dim), jnp.float32)
    b2 = 0.01 * jax.random.normal(k5, (1, latent_dim), jnp.float32)
    w3 = scale * jax.random.normal(k3, (latent_dim, 1), jnp.float32)
    b3 = 0.01 * jax.random.normal(k6, (1, 1), jnp.float32)
    return w1, b1, w2, b2, w3, b3


def reference_forward(fps, w1, b1, w2, b2, w3, b3):
    h = jnp.maximum(fps @ w1 + b1, 0.0)
    h = jnp.maximum(h @ w2 + b2, 0.0)
    y = h @ w3 + b3
    return jnp.maximum(y, 0.0) + jnp.log(1.0 + jnp.exp(-jnp.abs(y)))


if __name__ == "__main__":
    # Shapes consistent with the module: ValueMLP(n_layers=2, fp_dim=256,
    # latent_dim=128, dropout_rate=0.1, device=...).  B is deliberately not a
    # multiple of the block size to exercise the ragged-tail path, and large enough
    # to get a 2-step grid.
    B, fp_dim, latent_dim, n_layers = 520, 256, 128, 2

    key = jax.random.PRNGKey(0)
    k_x, k_p = jax.random.split(key)
    fps = jax.random.normal(k_x, (B, fp_dim), jnp.float32)
    params = init_params(k_p, fp_dim, latent_dim, n_layers)
    ref = reference_forward(fps, *params)

    # f32 compute path (exact check).
    out_f32 = jax.block_until_ready(
        value_mlp_forward(fps, *params, block_b=512, compute_dtype=jnp.float32))
    assert out_f32.shape == (B, 1), out_f32.shape
    assert jnp.allclose(out_f32, ref, atol=1e-5, rtol=1e-5)

    # bf16 streaming path (default on all generations; f32 accumulation).
    out_bf16 = jax.block_until_ready(
        value_mlp_forward(fps, *params, compute_dtype=jnp.bfloat16))
    assert out_bf16.shape == (B, 1), out_bf16.shape
    assert jnp.allclose(out_bf16, ref, atol=5e-2, rtol=5e-2)

    print("KERNEL_OK")
</pallas_src>

<mosaic_0001>
module attributes {stable_mosaic.version = 11 : i64} {
  func.func @_value_mlp_kernel(%arg0: i32, %arg1: memref<384x256xf32, #tpu.memory_space<vmem>>, %arg2: memref<256x128xf32, #tpu.memory_space<vmem>>, %arg3: memref<1x128xf32, #tpu.memory_space<vmem>>, %arg4: memref<128x128xf32, #tpu.memory_space<vmem>>, %arg5: memref<1x128xf32, #tpu.memory_space<vmem>>, %arg6: memref<1x128xf32, #tpu.memory_space<vmem>>, %arg7: memref<1x1xf32, #tpu.memory_space<smem>>, %arg8: memref<1x384xf32, #tpu.memory_space<vmem>>) attributes {dimension_semantics = [#tpu.dimension_semantics<parallel>], iteration_bounds = array<i64: 2>, scalar_prefetch = 0 : i64, scratch_operands = 0 : i64, tpu.core_type = #tpu.core_type<tc>, window_params = [{transform_indices = @transform_0, window_bounds = array<i64: 384, 256>}, {pipeline_mode = #tpu.pipeline_mode<synchronous>, transform_indices = @transform_1, window_bounds = array<i64: 256, 128>}, {pipeline_mode = #tpu.pipeline_mode<synchronous>, transform_indices = @transform_2, window_bounds = array<i64: 1, 128>}, {pipeline_mode = #tpu.pipeline_mode<synchronous>, transform_indices = @transform_3, window_bounds = array<i64: 128, 128>}, {pipeline_mode = #tpu.pipeline_mode<synchronous>, transform_indices = @transform_4, window_bounds = array<i64: 1, 128>}, {pipeline_mode = #tpu.pipeline_mode<synchronous>, transform_indices = @transform_5, window_bounds = array<i64: 1, 128>}, {transform_indices = @transform_6, window_bounds = array<i64: 1, 1>}, {transform_indices = @transform_7, window_bounds = array<i64: 1, 384>}]} {
    %c0 = arith.constant 0 : index
    %c0_0 = arith.constant 0 : index
    %0 = vector.load %arg1[%c0, %c0_0] : memref<384x256xf32, #tpu.memory_space<vmem>>, vector<384x256xf32>
    %c0_1 = arith.constant 0 : index
    %c0_2 = arith.constant 0 : index
    %1 = vector.load %arg2[%c0_1, %c0_2] : memref<256x128xf32, #tpu.memory_space<vmem>>, vector<256x128xf32>
    %cst = arith.constant dense<0.000000e+00> : vector<384x128xf32>
    %2 = tpu.matmul %0, %1, %cst {dimension_numbers = #tpu.dot_dimension_numbers<[1], [0], [0], [1], [0, 0, 1, 1], [], []>} : vector<384x256xf32>, vector<256x128xf32>, vector<384x128xf32> -> vector<384x128xf32>
    %c0_3 = arith.constant 0 : index
    %c0_4 = arith.constant 0 : index
    %3 = vector.load %arg3[%c0_3, %c0_4] : memref<1x128xf32, #tpu.memory_space<vmem>>, vector<1x128xf32>
    %4 = vector.broadcast %3 : vector<1x128xf32> to vector<384x128xf32>
    %5 = arith.addf %2, %4 : vector<384x128xf32>
    %cst_5 = arith.constant 0.000000e+00 : f32
    %6 = vector.broadcast %cst_5 : f32 to vector<384x128xf32>
    %7 = arith.maximumf %5, %6 : vector<384x128xf32>
    %c0_6 = arith.constant 0 : index
    %c0_7 = arith.constant 0 : index
    %8 = vector.load %arg4[%c0_6, %c0_7] : memref<128x128xf32, #tpu.memory_space<vmem>>, vector<128x128xf32>
    %cst_8 = arith.constant dense<0.000000e+00> : vector<384x128xf32>
    %9 = tpu.matmul %7, %8, %cst_8 {dimension_numbers = #tpu.dot_dimension_numbers<[1], [0], [0], [1], [0, 0, 1, 1], [], []>} : vector<384x128xf32>, vector<128x128xf32>, vector<384x128xf32> -> vector<384x128xf32>
    %c0_9 = arith.constant 0 : index
    %c0_10 = arith.constant 0 : index
    %10 = vector.load %arg5[%c0_9, %c0_10] : memref<1x128xf32, #tpu.memory_space<vmem>>, vector<1x128xf32>
    %11 = vector.broadcast %10 : vector<1x128xf32> to vector<384x128xf32>
    %12 = arith.addf %9, %11 : vector<384x128xf32>
    %cst_11 = arith.constant 0.000000e+00 : f32
    %13 = vector.broadcast %cst_11 : f32 to vector<384x128xf32>
    %14 = arith.maximumf %12, %13 : vector<384x128xf32>
    %c0_12 = arith.constant 0 : index
    %c0_13 = arith.constant 0 : index
    %15 = vector.load %arg6[%c0_12, %c0_13] : memref<1x128xf32, #tpu.memory_space<vmem>>, vector<1x128xf32>
    %cst_14 = arith.constant dense<0.000000e+00> : vector<1x384xf32>
    %16 = tpu.matmul %15, %14, %cst_14 {dimension_numbers = #tpu.dot_dimension_numbers<[1], [1], [0], [0], [0, 0, 1, 0], [], []>} : vector<1x128xf32>, vector<384x128xf32>, vector<1x384xf32> -> vector<1x384xf32>
    %c0_15 = arith.constant 0 : index
    %c0_16 = arith.constant 0 : index
    %17 = memref.load %arg7[%c0_15, %c0_16] : memref<1x1xf32, #tpu.memory_space<smem>>
    %18 = vector.broadcast %17 : f32 to vector<1x384xf32>
    %19 = arith.addf %16, %18 : vector<1x384xf32>
    %cst_17 = arith.constant 0.000000e+00 : f32
    %20 = vector.broadcast %cst_17 : f32 to vector<1x384xf32>
    %21 = arith.maximumf %19, %20 : vector<1x384xf32>
    %22 = math.absf %19 : vector<1x384xf32>
    %cst_18 = arith.constant 0.000000e+00 : f32
    %23 = vector.broadcast %cst_18 : f32 to vector<1x384xf32>
    %24 = arith.subf %23, %22 : vector<1x384xf32>
    %25 = math.exp %24 : vector<1x384xf32>
    %cst_19 = arith.constant 1.000000e+00 : f32
    %26 = vector.broadcast %cst_19 : f32 to vector<1x384xf32>
    %27 = arith.addf %26, %25 : vector<1x384xf32>
    %28 = math.log %27 : vector<1x384xf32>
    %29 = arith.addf %21, %28 : vector<1x384xf32>
    %c0_20 = arith.constant 0 : index
    %c0_21 = arith.constant 0 : index
    %30 = vector.load %arg8[%c0_20, %c0_21] : memref<1x384xf32, #tpu.memory_space<vmem>>, vector<1x384xf32>
    tpu.vector_store %arg8[%c0_20, %c0_21], %29 {strides = array<i32>} : memref<1x384xf32, #tpu.memory_space<vmem>>, vector<1x384xf32>,
    return
  }
  func.func @transform_0(%arg0: i32) -> (i32, i32) {
    %c0_i32 = arith.constant 0 : i32
    %c0_i32_0 = arith.constant 0 : i32
    return %arg0, %c0_i32 : i32, i32
  }
  func.func @transform_1(%arg0: i32) -> (i32, i32) {
    %c0_i32 = arith.constant 0 : i32
    %c0_i32_0 = arith.constant 0 : i32
    %c0_i32_1 = arith.constant 0 : i32
    return %c0_i32, %c0_i32_0 : i32, i32
  }
  func.func @transform_2(%arg0: i32) -> (i32, i32) {
    %c0_i32 = arith.constant 0 : i32
    %c0_i32_0 = arith.constant 0 : i32
    %c0_i32_1 = arith.constant 0 : i32
    return %c0_i32, %c0_i32_0 : i32, i32
  }
  func.func @transform_3(%arg0: i32) -> (i32, i32) {
    %c0_i32 = arith.constant 0 : i32
    %c0_i32_0 = arith.constant 0 : i32
    %c0_i32_1 = arith.constant 0 : i32
    return %c0_i32, %c0_i32_0 : i32, i32
  }
  func.func @transform_4(%arg0: i32) -> (i32, i32) {
    %c0_i32 = arith.constant 0 : i32
    %c0_i32_0 = arith.constant 0 : i32
    %c0_i32_1 = arith.constant 0 : i32
    return %c0_i32, %c0_i32_0 : i32, i32
  }
  func.func @transform_5(%arg0: i32) -> (i32, i32) {
    %c0_i32 = arith.constant 0 : i32
    %c0_i32_0 = arith.constant 0 : i32
    %c0_i32_1 = arith.constant 0 : i32
    return %c0_i32, %c0_i32_0 : i32, i32
  }
  func.func @transform_6(%arg0: i32) -> (i32, i32) {
    %c0_i32 = arith.constant 0 : i32
    %c0_i32_0 = arith.constant 0 : i32
    %c0_i32_1 = arith.constant 0 : i32
    return %c0_i32, %c0_i32_0 : i32, i32
  }
  func.func @transform_7(%arg0: i32) -> (i32, i32) {
    %c0_i32 = arith.constant 0 : i32
    %c0_i32_0 = arith.constant 0 : i32
    return %c0_i32, %arg0 : i32, i32
  }
}

</mosaic_0001>

<bundles_post_ra>
// kernel: value_mlp_forward.1
= control target key start
LH: loop header
LB: loop body
LE: loop exit
PB: predicated region body
PF: predicated region fallthrough
CT: control target
= control target key end

     0   :  { %s1976_s0 = inlined_call_operand.hbm [shape: f32[520,256], index: 0, kind: input, shape index: {}]   ;;  %s1977_s1 = inlined_call_operand.hbm [shape: f32[256,128], index: 1, kind: input, shape index: {}]   ;;  %s1978_s2 = inlined_call_operand.vmem [shape: f32[1,128], index: 2, kind: input, shape index: {}]   ;;  %s1979_s3 = inlined_call_operand.hbm [shape: f32[128,128], index: 3, kind: input, shape index: {}]   ;;  %s1980_s4 = inlined_call_operand.vmem [shape: f32[1,128], index: 4, kind: input, shape index: {}]   ;;  %s1981_s5 = inlined_call_operand.vmem [shape: f32[1,128], index: 5, kind: input, shape index: {}]   ;;  %s1982_s6 = inlined_call_operand.<no memory space> [shape: f32[1,1], index: 6, kind: input, shape index: {}]   ;;  %s1983_s7 = inlined_call_operand.vmem [shape: f32[1,768], index: 7, kind: output, shape index: {}]  }
   0x1   :  { %12 = sst [smem:[#allocation2]] %s1982_s6 }
   0x2   :  { %13 = vsyncpa [#allocation4], 0 }
   0x3   :  { %15 = vsyncpa [#allocation4 + $0x1], 0 }
   0x4   :  { %16 = vsyncpa [#allocation6], 0  ;;  %s1550_s26 = smov 0   ;;  %s1552_s27 = smov 0  }
   0x5   :  { %s1554_s28 = smov 0   ;;  %s1556_s29 = smov 0  }
   0x6 LB: > { %s1984_s6 = sadd.s32 4294967295, %s1498_s29   ;;  %s1570_s30 = sadd.s32 1, %s1498_s29   ;;  %s1498_s29 = sphi %s1556_s29, %s1994_s29   ;;  %s1494_s28 = sphi %s1554_s28, %s1993_s28   ;;  %s1490_s27 = sphi %s1552_s27, %s1992_s27   ;;  %s1486_s26 = sphi %s1550_s26, %s1991_s26  }
   0x7   : > { %s26_s8 = ssub.s32 %s1498_s29, %s1570_s30  ;;  %s29_s9 = sadd.s32 1, %s1494_s28 }
   0x8   : > { %p27_p0 = scmp.eq.s32.totalorder %s26_s8, 0  ;;  %p36_p1 = scmp.ne.s32.totalorder %s1494_s28, %s1490_s27 }
   0x9   : > { %p37_p2 = scmp.eq.s32.totalorder %s1498_s29, 0  ;;  %p42_p3 = scmp.ne.s32.totalorder %s1490_s27, %s1486_s26 }
   0xa   : > { %s1580_s10 = scalar_select %p27_p0, %s1494_s28, %s29_s9  }
   0xb   : > { %p1582_p4 = por %p37_p2, %p36_p1  ;;  %p1588_p5 = scmp.eq.s32.totalorder %s1984_s6, 0 }
   0xc   : > { %p1267_p6 = scmp.ge.s32.totalorder %s1498_s29, 1  ;;  %p205_p7 = scmp.lt.s32.totalorder %s1498_s29, 3 }
   0xd   : > { %p1596_p8 = por %p1588_p5, %p42_p3  ;;  %s216_s17 = sshll.u32 %s1977_s1, 4  ;;  %s217_s17 = int_to_ptr.hbm [resolvable:$true] %s216_s17 }
   0xe   : > { %p1600_p9 = pnand %p1267_p6, %p205_p7  ;;  %s1500_s18 = smov [#allocation5]  }
   0xf   : > { %s218_s19 = sshll.u32 %s1500_s18, 4  ;;  %s233_s22 = sshll.u32 %s1979_s3, 4  ;;  %s219_s19 = int_to_ptr.vmem [resolvable:$true] %s218_s19  ;;  %s234_s22 = int_to_ptr.hbm [resolvable:$true] %s233_s22 }
  0x10   : > { %p1298_p10 = pneg %p1600_p9  ;;  %s1501_s23 = smov 128  }
  0x11   : > { %s1502_s24 = smov 8   ;;  %s1503_s25 = smov [#allocation7]  }
  0x12   : > { %p1299_p11 = pnand %p1298_p10, %p1588_p5  ;;  %s235_s26 = sshll.u32 %s1503_s25, 4  ;;  %s236_s26 = int_to_ptr.vmem [resolvable:$true] %s235_s26 }
  0x13   : > { %p1270_p12 = scmp.ge.s32.totalorder %s1498_s29, 2 }
  0x14   : > { %1301 = dma.hbm_to_vmem [thread:$0]  (!%p1299_p11), %s217_s17, 4096, %s219_s19, [#allocation6], %s1501_s23, %s1501_s23, %s1502_s24  }
  0x15   : > { %1304 = dma.hbm_to_vmem [thread:$0]  (!%p1299_p11), %s234_s22, 2048, %s236_s26, [#allocation6], %s1501_s23, %s1501_s23, %s1502_s24  }
  0x16   : > { %254 = sbr.rel (%p1270_p12) target bundleno = 65 (0x41), region = 40 }
  0x1b   : > { %257 = sbr.rel (!%p1582_p4) target bundleno = 65 (0x41), region = 44  ;;  %s258_s8 = sand.u32 (%p1582_p4), 1, %s1494_s28  }
  0x1c   : > { %s263_s9 = smul.u32 (%p1582_p4), 48, %s1498_s29  ;;  %s1622_s20 = scalar_lea.sflag (%p1582_p4), [#allocation4], %s258_s8 }
  0x1d   : > { %s1287_s15 = smul.u32 (%p1582_p4), 768, %s258_s8 }
  0x1e   : > { %s264_s16 = ssub.s32 (%p1582_p4), 65, %s263_s9 }
  0x1f   : > { %p265_p13 = scmp.lt.s32.totalorder (%p1582_p4), %s264_s16, 48  ;;  %s262_s21 = scalar_lea.vmem (%p1582_p4), [#allocation3], %s1287_s15 }
  0x21   : > { %s1996_s16 = smov (!%p265_p13, %s264_s16), 48 }
  0x22   : > { %s1283_s17 = sshll.u32 %s1996_s16, 4 }
  0x23   : > { %s269_s18 = ssub.s32 768, %s1283_s17 }
  0x24   : > { %s270_s19 = sshll.u32 %s269_s18, 4 }
  0x25   : > { %271 = vsyncadd %s1622_s20, %s270_s19  ;;  %p1625_p0 = scmp.ne.s32.totalorder %s1283_s17, 0  ;;  %s1286_s22 = smul.u32 768, %s1498_s29 }
  0x26   : > { %s1630_s23 = sshll.u32 %s262_s21, 4  ;;  %s1277_s24 = sshll.u32 %s1996_s16, 8  ;;  %s280_s23 = int_to_ptr.vmem [resolvable:$true] %s1630_s23 }
  0x27   : > { %s275_s8 = scalar_lea.hbm %s1976_s0, %s1286_s22  ;;  %s1423_s17 = sshrl.u32 %s1277_s24, 4 }
  0x28   : > { %s277_s9 = sshll.u32 %s275_s8, 4  ;;  %s1432_s6 = scalar_lea.hbm %s1976_s0, 1040  ;;  %s1637_s9 = int_to_ptr.hbm [resolvable:$true] %s277_s9 }
  0x29   : > { %s1421_s15 = sshra.s32 %s1637_s9, 4  ;;  %s1422_s15 = int_to_ptr.hbm [resolvable:$true] %s1421_s15 }
  0x2a   : > { %s1428_s18 = scalar_lea.hbm %s1422_s15, %s1423_s17  ;;  %p1433_p4 = scmp.lt.s32.totalorder %s1422_s15, %s1976_s0 }
  0x2b   : > { %p1429_p1 = scmp.ne.s32.totalorder %s1422_s15, %s1428_s18  ;;  %p1434_p6 = scmp.lt.s32.totalorder %s1432_s6, %s1428_s18 }
  0x2d   : > { %p1430_p2 = pnand %p1429_p1, %p1625_p0  ;;  %p1435_p7 = por %p1434_p6, %p1433_p4 }
  0x2f   : > { %p1431_p3 = pneg %p1430_p2 }
  0x31   : > { %p1436_p10 = pnand %p1435_p7, %p1431_p3 }
  0x33   : > { %1439 = shalt.err (!%p1436_p10)
}
  0x34   : > { %s1440_s26 = sshra.s32 %s280_s23, 4  ;;  %s1504_s19 = smov [#allocation3]   ;;  %s1441_s26 = int_to_ptr.vmem [resolvable:$true] %s1440_s26 }
  0x35   : > { %s1447_s8 = scalar_lea.vmem %s1441_s26, %s1423_s17  ;;  %s1451_s21 = scalar_lea.vmem %s1504_s19, 1536 }
  0x36   : > { %p1448_p11 = scmp.ne.s32.totalorder %s1441_s26, %s1447_s8  ;;  %p1453_p1 = scmp.lt.s32.totalorder %s1451_s21, %s1447_s8 }
  0x38   : > { %p1449_p12 = pnand %p1448_p11, %p1625_p0 }
  0x3a   : > { %p1450_p13 = pneg %p1449_p12 }
  0x3c   : > { %p1455_p2 = pnand %p1453_p1, %p1450_p13 }
  0x3e   : > { %1458 = shalt.err (!%p1455_p2)
}
  0x3f   : > { %s1505_s15 = smov 256   ;;  %s1506_s6 = smov 16  }
  0x40   : > { %285 = dma.hbm_to_vmem [thread:$0]  (%p1625_p0), %s1637_s9, %s1277_s24, %s280_s23, %s1622_s20, %s1505_s15, %s1505_s15, %s1506_s6  }
  0x41 PF: > { %291 = sbr.rel (%p1600_p9) target bundleno = 976 (0x3d0), region = 48  ;;  %s293_s17 = sand.u32 (!%p1600_p9), 1, %s1490_s27  }
  0x42   : > { %s1288_s18 = smul.u32 (!%p1600_p9), 768, %s293_s17  ;;  %s294_s25 = scalar_lea.sflag (!%p1600_p9), [#allocation4], %s293_s17 }
  0x44   : > { %s1665_s22 = scalar_lea.vmem (!%p1600_p9), [#allocation3], %s1288_s18 }
  0x46   : > { %1477 = dma.done.wait (%p1596_p8), %s294_s25, 12288  }
  0x47   : > { %1479 = vsyncadd (%p1596_p8), %s294_s25, 4294955008 }
  0x48   : > { %1481 = dma.done.wait (%p1588_p5), [#allocation6], 6144  }
  0x49   : > { %1483 = vsyncadd (%p1588_p5), [#allocation6], 4294961152  ;;  %v460_v0 = vld [vmem:[#allocation5 + $0x78] sm:$0xff]  ;;  %v459_v1 = vld [vmem:[#allocation5 + $0x70] sm:$0xff]  ;;  %s1081_s23 = sld [smem:[#allocation2]]  ;;  %s1990_s24 = sadd.s32 4294967295, %s1498_s29  }
  0x4a   : > { %v476_v2 = vld [vmem:[#allocation5 + $0xf8] sm:$0xff]  ;;  %481 = vmatpush.msra.mxu0 %v460_v0  ;;  %v475_v3 = vld [vmem:[#allocation5 + $0xf0] sm:$0xff]  ;;  %v458_v4 = vld [vmem:[#allocation5 + $0x68] sm:$0xff]  ;;  %s344_s9 = smul.u32 3, %s1990_s24  ;;  %vm1175_vm0 = vcmask 1040384   ;;  %vm1177_vm1 = vcmask 1041408  }
  0x4b   : > { %642 = vmatpush.msra.mxu1 %v476_v2  ;;  %v474_v5 = vld [vmem:[#allocation5 + $0xe8] sm:$0xff]  ;;  %v457_v6 = vld [vmem:[#allocation5 + $0x60] sm:$0xff]  ;;  %v456_v8 = vld [vmem:[#allocation5 + $0x58] sm:$0xff] }
  0x4c   : > { %482 = vmatpush.msra.mxu0 %v459_v1  ;;  %v473_v7 = vld [vmem:[#allocation5 + $0xe0] sm:$0xff]  ;;  %v472_v9 = vld [vmem:[#allocation5 + $0xd8] sm:$0xff]  ;;  %v455_v10 = vld [vmem:[#allocation5 + $0x50] sm:$0xff]  ;;  %p345_p5 = scmp.lt.s32.totalorder %s344_s9, 5 }
  0x4d   : > { %643 = vmatpush.msra.mxu1 %v475_v3  ;;  %v471_v11 = vld [vmem:[#allocation5 + $0xd0] sm:$0xff]  ;;  %v454_v12 = vld [vmem:[#allocation5 + $0x48] sm:$0xff]  ;;  %v453_v14 = vld [vmem:[#allocation5 + $0x40] sm:$0xff] }
  0x4e   : > { %483 = vmatpush.msra.mxu0 %v458_v4  ;;  %v470_v13 = vld [vmem:[#allocation5 + $0xc8] sm:$0xff]  ;;  %v469_v15 = vld [vmem:[#allocation5 + $0xc0] sm:$0xff]  ;;  %v452_v16 = vld [vmem:[#allocation5 + $0x38] sm:$0xff]  ;;  %s1998_s9 = smov (!%p345_p5, %s344_s9), 5 }
  0x4f   : > { %644 = vmatpush.msra.mxu1 %v474_v5  ;;  %v468_v17 = vld [vmem:[#allocation5 + $0xb8] sm:$0xff]  ;;  %v451_v18 = vld [vmem:[#allocation5 + $0x30] sm:$0xff]  ;;  %v450_v20 = vld [vmem:[#allocation5 + $0x28] sm:$0xff]  ;;  %s347_s8 = scalar_lea.vmem %s1983_s7, %s1998_s9 }
  0x50   : > { %484 = vmatpush.msra.mxu0 %v457_v6  ;;  %v467_v19 = vld [vmem:[#allocation5 + $0xb0] sm:$0xff]  ;;  %v466_v21 = vld [vmem:[#allocation5 + $0xa8] sm:$0xff]  ;;  %v449_v22 = vld [vmem:[#allocation5 + $0x20] sm:$0xff] }
  0x51   : > { %645 = vmatpush.msra.mxu1 %v473_v7  ;;  %v465_v23 = vld [vmem:[#allocation5 + $0xa0] sm:$0xff]  ;;  %v448_v24 = vld [vmem:[#allocation5 + $0x18] sm:$0xff]  ;;  %v447_v26 = vld [vmem:[#allocation5 + $0x10] sm:$0xff] }
  0x52   : > { %485 = vmatpush.msra.mxu0 %v456_v8  ;;  %v464_v25 = vld [vmem:[#allocation5 + $0x98] sm:$0xff]  ;;  %v463_v27 = vld [vmem:[#allocation5 + $0x90] sm:$0xff]  ;;  %v446_v28 = vld [vmem:[#allocation5 + $0x8] sm:$0xff] }
  0x53   : > { %646 = vmatpush.msra.mxu1 %v472_v9  ;;  %v462_v29 = vld [vmem:[#allocation5 + $0x88] sm:$0xff]  ;;  %v445_v30 = vld [vmem:[#allocation5] sm:$0xff]  ;;  %v351_v34 = vld [vmem:[%s1665_s22 + $0x10] sm:$0xff] }
  0x54   : > { %486 = vmatpush.msra.mxu0 %v455_v10  ;;  %v461_v31 = vld [vmem:[#allocation5 + $0x80] sm:$0xff]  ;;  %v350_v33 = vld [vmem:[%s1665_s22 + $0x8] sm:$0xff]  ;;  %v352_v35 = vld [vmem:[%s1665_s22 + $0x18] sm:$0xff] }
  0x55   : > { %647 = vmatpush.msra.mxu1 %v471_v11  ;;  %v349_v32 = vld [vmem:[%s1665_s22] sm:$0xff]  ;;  %v354_v37 = vld [vmem:[%s1665_s22 + $0x28] sm:$0xff]  ;;  %v355_v38 = vld [vmem:[%s1665_s22 + $0x30] sm:$0xff] }
  0x56   : > { %487 = vmatpush.msra.mxu0 %v454_v12  ;;  %v353_v36 = vld [vmem:[%s1665_s22 + $0x20] sm:$0xff]  ;;  %v356_v39 = vld [vmem:[%s1665_s22 + $0x38] sm:$0xff]  ;;  %v358_v41 = vld [vmem:[%s1665_s22 + $0x48] sm:$0xff] }
  0x57   : > { %648 = vmatpush.msra.mxu1 %v470_v13  ;;  %v357_v40 = vld [vmem:[%s1665_s22 + $0x40] sm:$0xff]  ;;  %v359_v42 = vld [vmem:[%s1665_s22 + $0x50] sm:$0xff]  ;;  %v360_v43 = vld [vmem:[%s1665_s22 + $0x58] sm:$0xff] }
  0x58   : > { %488 = vmatpush.msra.mxu0 %v453_v14  ;;  %v361_v44 = vld [vmem:[%s1665_s22 + $0x60] sm:$0xff]  ;;  %v362_v45 = vld [vmem:[%s1665_s22 + $0x68] sm:$0xff]  ;;  %v363_v46 = vld [vmem:[%s1665_s22 + $0x70] sm:$0xff] }
  0x59   : > { %649 = vmatpush.msra.mxu1 %v469_v15  ;;  %v364_v47 = vld [vmem:[%s1665_s22 + $0x78] sm:$0xff]  ;;  %v365_v48 = vld [vmem:[%s1665_s22 + $0x80] sm:$0xff]  ;;  %v366_v49 = vld [vmem:[%s1665_s22 + $0x88] sm:$0xff] }
  0x5a   : > { %489 = vmatpush.msra.mxu0 %v452_v16  ;;  %v866_v50 = vld [vmem:[#allocation7 + $0x78] sm:$0xff]  ;;  %v865_v51 = vld [vmem:[#allocation7 + $0x70] sm:$0xff]  ;;  %v864_v54 = vld [vmem:[#allocation7 + $0x68] sm:$0xff] }
  0x5b   : > { %650 = vmatpush.msra.mxu1 %v468_v17  ;;  %871 = vmatpush.msra.mxu2 %v866_v50  ;;  %v367_v52 = vld [vmem:[%s1665_s22 + $0x90] sm:$0xff]  ;;  %v368_v53 = vld [vmem:[%s1665_s22 + $0x98] sm:$0xff]  ;;  %v863_v55 = vld [vmem:[#allocation7 + $0x60] sm:$0xff] }
  0x5c   : > { %490 = vmatpush.msra.mxu0 %v451_v18  ;;  %v862_v56 = vld [vmem:[#allocation7 + $0x58] sm:$0xff]  ;;  %v861_v57 = vld [vmem:[#allocation7 + $0x50] sm:$0xff]  ;;  %v369_v58 = vld [vmem:[%s1665_s22 + $0xa0] sm:$0xff] }
  0x5d   : > { %651 = vmatpush.msra.mxu1 %v467_v19  ;;  %872 = vmatpush.msra.mxu2 %v865_v51  ;;  %v370_v59 = vld [vmem:[%s1665_s22 + $0xa8] sm:$0xff]  ;;  %v859_v61 = vld [vmem:[#allocation7 + $0x40] sm:$0xff]  ;;  %v858_v62 = vld [vmem:[#allocation7 + $0x38] sm:$0xff] }
  0x5e   : > { %491 = vmatpush.msra.mxu0 %v450_v20  ;;  %v860_v60 = vld [vmem:[#allocation7 + $0x48] sm:$0xff]  ;;  %v857_v63 = vld [vmem:[#allocation7 + $0x30] sm:$0xff]  ;;  %v372_v1 = vld [vmem:[%s1665_s22 + $0xb8] sm:$0xff] }
  0x5f   : > { %652 = vmatpush.msra.mxu1 %v466_v21  ;;  %873 = vmatpush.msra.mxu2 %v864_v54  ;;  %v371_v0 = vld [vmem:[%s1665_s22 + $0xb0] sm:$0xff]  ;;  %v856_v2 = vld [vmem:[#allocation7 + $0x28] sm:$0xff]  ;;  %v855_v3 = vld [vmem:[#allocation7 + $0x20] sm:$0xff] }
  0x60   : > { %492 = vmatpush.msra.mxu0 %v449_v22  ;;  %v854_v4 = vld [vmem:[#allocation7 + $0x18] sm:$0xff]  ;;  %v373_v5 = vld [vmem:[%s1665_s22 + $0xc0] sm:$0xff]  ;;  %v374_v6 = vld [vmem:[%s1665_s22 + $0xc8] sm:$0xff] }
  0x61   : > { %653 = vmatpush.msra.mxu1 %v465_v23  ;;  %874 = vmatpush.msra.mxu2 %v863_v55  ;;  %v853_v7 = vld [vmem:[#allocation7 + $0x10] sm:$0xff]  ;;  %v852_v8 = vld [vmem:[#allocation7 + $0x8] sm:$0xff]  ;;  %v851_v9 = vld [vmem:[#allocation7] sm:$0xff] }
  0x62   : > { %493 = vmatpush.msra.mxu0 %v448_v24  ;;  %v375_v10 = vld [vmem:[%s1665_s22 + $0xd0] sm:$0xff]  ;;  %v376_v11 = vld [vmem:[%s1665_s22 + $0xd8] sm:$0xff]  ;;  %v377_v12 = vld [vmem:[%s1665_s22 + $0xe0] sm:$0xff] }
  0x63   : > { %654 = vmatpush.msra.mxu1 %v464_v25  ;;  %875 = vmatpush.msra.mxu2 %v862_v56  ;;  %v378_v13 = vld [vmem:[%s1665_s22 + $0xe8] sm:$0xff]  ;;  %v379_v14 = vld [vmem:[%s1665_s22 + $0xf0] sm:$0xff]  ;;  %v380_v15 = vld [vmem:[%s1665_s22 + $0xf8] sm:$0xff] }
  0x64   : > { %494 = vmatpush.msra.mxu0 %v447_v26  ;;  %v1710_v16 = vld [vmem:[%s1978_s2] ss:$0 sm:$0xff]  ;;  %v382_v20 = vld [vmem:[%s1665_s22 + $0x108] sm:$0xff]  ;;  %v383_v26 = vld [vmem:[%s1665_s22 + $0x110] sm:$0xff] }
  0x65   : > { %655 = vmatpush.msra.mxu1 %v463_v27  ;;  %876 = vmatpush.msra.mxu2 %v861_v57  ;;  %v381_v19 = vld [vmem:[%s1665_s22 + $0x100] sm:$0xff]  ;;  %v384_v27 = vld [vmem:[%s1665_s22 + $0x118] sm:$0xff]  ;;  %v391_v54 = vld [vmem:[%s1665_s22 + $0x150] sm:$0xff] }
  0x66   : > { %495 = vmatpush.msra.mxu0 %v446_v28  ;;  %v392_v55 = vld [vmem:[%s1665_s22 + $0x158] sm:$0xff] }
  0x67   : > { %656 = vmatpush.msra.mxu1 %v462_v29  ;;  %877 = vmatpush.msra.mxu2 %v860_v60 }
  0x68   : > { %496 = vmatpush.msra.mxu0 %v445_v30 }
  0x69   : > { %657 = vmatpush.msra.mxu1 %v461_v31  ;;  %497 = vmatmul.f32.vlgmr.msra.gmra.mxu0 %v349_v32 }
  0x6a   : > { %658 = vmatmul.f32.vlgmr.msra.gmra.mxu1 %v350_v33  ;;  %878 = vmatpush.msra.mxu2 %v859_v61  ;;  %v385_v33 = vld [vmem:[%s1665_s22 + $0x120] sm:$0xff] }
  0x6b   : > { %v393_v61 = vld [vmem:[%s1665_s22 + $0x160] sm:$0xff] }
  0x6c   : > { %879 = vmatpush.msra.mxu2 %v858_v62  ;;  %v394_v62 = vld [vmem:[%s1665_s22 + $0x168] sm:$0xff] }
  0x6e   : > { %880 = vmatpush.msra.mxu2 %v857_v63 }
  0x70   : > { %881 = vmatpush.msra.mxu2 %v856_v2 }
  0x71   : > { %500 = vmatmul.f32.gmra.mxu0 %v351_v34  ;;  %v386_v34 = vld [vmem:[%s1665_s22 + $0x128] sm:$0xff] }
  0x72   : > { %661 = vmatmul.f32.gmra.mxu1 %v352_v35  ;;  %882 = vmatpush.msra.mxu2 %v855_v3 }
  0x74   : > { %883 = vmatpush.msra.mxu2 %v854_v4  ;;  %v395_v4 = vld [vmem:[%s1665_s22 + $0x170] sm:$0xff] }
  0x76   : > { %884 = vmatpush.msra.mxu2 %v853_v7 }
  0x78   : > { %885 = vmatpush.msra.mxu2 %v852_v8 }
  0x79   : > { %503 = vmatmul.f32.gmra.mxu0 %v353_v36 }
  0x7a   : > { %664 = vmatmul.f32.gmra.mxu1 %v354_v37  ;;  %886 = vmatpush.msra.mxu2 %v851_v9 }
  0x81   : > { %506 = vmatmul.f32.gmra.mxu0 %v355_v38 }
  0x82   : > { %667 = vmatmul.f32.gmra.mxu1 %v356_v39 }
  0x89   : > { %509 = vmatmul.f32.gmra.mxu0 %v357_v40  ;;  %v387_v40 = vld [vmem:[%s1665_s22 + $0x130] sm:$0xff] }
  0x8a   : > { %670 = vmatmul.f32.gmra.mxu1 %v358_v41  ;;  %v388_v41 = vld [vmem:[%s1665_s22 + $0x138] sm:$0xff] }
  0x91   : > { %512 = vmatmul.f32.gmra.mxu0 %v359_v42 }
  0x92   : > { %673 = vmatmul.f32.gmra.mxu1 %v360_v43 }
  0x99   : > { %515 = vmatmul.f32.gmra.mxu0 %v361_v44 }
  0x9a   : > { %676 = vmatmul.f32.gmra.mxu1 %v362_v45 }
  0xa1   : > { %518 = vmatmul.f32.gmra.mxu0 %v363_v46 }
  0xa2   : > { %679 = vmatmul.f32.gmra.mxu1 %v364_v47  ;;  %v389_v47 = vld [vmem:[%s1665_s22 + $0x140] sm:$0xff] }
  0xa9   : > { %521 = vmatmul.f32.gmra.mxu0 %v365_v48  ;;  %v390_v48 = vld [vmem:[%s1665_s22 + $0x148] sm:$0xff] }
  0xaa   : > { %682 = vmatmul.f32.gmra.mxu1 %v366_v49 }
  0xb1   : > { %524 = vmatmul.f32.gmra.mxu0 %v367_v52 }
  0xb2   : > { %685 = vmatmul.f32.gmra.mxu1 %v368_v53 }
  0xb9   : > { %527 = vmatmul.f32.gmra.mxu0 %v369_v58 }
  0xba   : > { %688 = vmatmul.f32.gmra.mxu1 %v370_v59 }
  0xc1   : > { %530 = vmatmul.f32.gmra.mxu0 %v371_v0 }
  0xc2   : > { %691 = vmatmul.f32.gmra.mxu1 %v372_v1 }
  0xc9   : > { %533 = vmatmul.f32.gmra.mxu0 %v373_v5  ;;  %v396_v5 = vld [vmem:[%s1665_s22 + $0x178] sm:$0xff] }
  0xca   : > { %694 = vmatmul.f32.gmra.mxu1 %v374_v6 }
  0xd1   : > { %536 = vmatmul.f32.gmra.mxu0 %v375_v10 }
  0xd2   : > { %697 = vmatmul.f32.gmra.mxu1 %v376_v11  ;;  %v397_v11 = vld [vmem:[%s1665_s22 + $0x180] sm:$0xff] }
  0xd9   : > { %539 = vmatmul.f32.gmra.mxu0 %v377_v12  ;;  %v398_v12 = vld [vmem:[%s1665_s22 + $0x188] sm:$0xff] }
  0xda   : > { %700 = vmatmul.f32.gmra.mxu1 %v378_v13 }
  0xe1   : > { %542 = vmatmul.f32.gmra.mxu0 %v379_v14 }
  0xe2   : > { %703 = vmatmul.f32.gmra.mxu1 %v380_v15 }
  0xe6   : > { %v498_v17 = vpop.f32.mrf.mxu0 }
  0xe7   : > { %v659_v18 = vpop.f32.mrf.mxu1  ;;  %v499_v21 = vadd.f32 %v1710_v16, %v498_v17 }
  0xe9   : > { %v660_v22 = vadd.f32 %v659_v18, %v499_v21  ;;  %545 = vmatmul.f32.gmra.mxu0 %v381_v19  ;;  %v399_v19 = vld [vmem:[%s1665_s22 + $0x190] sm:$0xff] }
  0xea   : > { %706 = vmatmul.f32.gmra.mxu1 %v382_v20  ;;  %v400_v20 = vld [vmem:[%s1665_s22 + $0x198] sm:$0xff] }
  0xeb   : > { %v803_v23 = vmax.f32 %v660_v22, 0.0 }
  0xed   : > { %887 = vmatmul.f32.vlgmr.msra.gmra.mxu2 %v803_v23 }
  0xee   : > { %v501_v24 = vpop.f32.mrf.mxu0 }
  0xef   : > { %v662_v25 = vpop.f32.mrf.mxu1  ;;  %v502_v28 = vadd.f32 %v1710_v16, %v501_v24 }
  0xf1   : > { %v663_v29 = vadd.f32 %v662_v25, %v502_v28  ;;  %548 = vmatmul.f32.gmra.mxu0 %v383_v26  ;;  %v401_v26 = vld [vmem:[%s1665_s22 + $0x1a0] sm:$0xff] }
  0xf2   : > { %709 = vmatmul.f32.gmra.mxu1 %v384_v27  ;;  %v402_v27 = vld [vmem:[%s1665_s22 + $0x1a8] sm:$0xff] }
  0xf3   : > { %v804_v30 = vmax.f32 %v663_v29, 0.0 }
  0xf5   : > { %890 = vmatmul.f32.gmra.mxu2 %v804_v30 }
  0xf6   : > { %v504_v31 = vpop.f32.mrf.mxu0 }
  0xf7   : > { %v665_v32 = vpop.f32.mrf.mxu1  ;;  %v505_v35 = vadd.f32 %v1710_v16, %v504_v31 }
  0xf9   : > { %v666_v36 = vadd.f32 %v665_v32, %v505_v35  ;;  %551 = vmatmul.f32.gmra.mxu0 %v385_v33  ;;  %v403_v33 = vld [vmem:[%s1665_s22 + $0x1b0] sm:$0xff] }
  0xfa   : > { %712 = vmatmul.f32.gmra.mxu1 %v386_v34  ;;  %v404_v34 = vld [vmem:[%s1665_s22 + $0x1b8] sm:$0xff] }
  0xfb   : > { %v805_v37 = vmax.f32 %v666_v36, 0.0 }
  0xfd   : > { %893 = vmatmul.f32.gmra.mxu2 %v805_v37 }
  0xfe   : > { %v507_v38 = vpop.f32.mrf.mxu0 }
  0xff   : > { %v668_v39 = vpop.f32.mrf.mxu1  ;;  %v508_v42 = vadd.f32 %v1710_v16, %v507_v38 }
 0x101   : > { %v669_v43 = vadd.f32 %v668_v39, %v508_v42  ;;  %554 = vmatmul.f32.gmra.mxu0 %v387_v40  ;;  %v405_v40 = vld [vmem:[%s1665_s22 + $0x1c0] sm:$0xff] }
 0x102   : > { %715 = vmatmul.f32.gmra.mxu1 %v388_v41  ;;  %v406_v41 = vld [vmem:[%s1665_s22 + $0x1c8] sm:$0xff] }
 0x103   : > { %v806_v44 = vmax.f32 %v669_v43, 0.0 }
 0x105   : > { %896 = vmatmul.f32.gmra.mxu2 %v806_v44 }
 0x106   : > { %v510_v45 = vpop.f32.mrf.mxu0 }
 0x107   : > { %v671_v46 = vpop.f32.mrf.mxu1  ;;  %v511_v49 = vadd.f32 %v1710_v16, %v510_v45 }
 0x109   : > { %v672_v50 = vadd.f32 %v671_v46, %v511_v49  ;;  %557 = vmatmul.f32.gmra.mxu0 %v389_v47  ;;  %v407_v47 = vld [vmem:[%s1665_s22 + $0x1d0] sm:$0xff] }
 0x10a   : > { %718 = vmatmul.f32.gmra.mxu1 %v390_v48  ;;  %v408_v48 = vld [vmem:[%s1665_s22 + $0x1d8] sm:$0xff] }
 0x10b   : > { %v807_v51 = vmax.f32 %v672_v50, 0.0 }
 0x10d   : > { %899 = vmatmul.f32.gmra.mxu2 %v807_v51 }
 0x10e   : > { %v513_v52 = vpop.f32.mrf.mxu0 }
 0x10f   : > { %v674_v53 = vpop.f32.mrf.mxu1  ;;  %v514_v56 = vadd.f32 %v1710_v16, %v513_v52 }
 0x111   : > { %v675_v57 = vadd.f32 %v674_v53, %v514_v56  ;;  %560 = vmatmul.f32.gmra.mxu0 %v391_v54  ;;  %v409_v54 = vld [vmem:[%s1665_s22 + $0x1e0] sm:$0xff] }
 0x112   : > { %721 = vmatmul.f32.gmra.mxu1 %v392_v55  ;;  %v410_v55 = vld [vmem:[%s1665_s22 + $0x1e8] sm:$0xff] }
 0x113   : > { %v808_v58 = vmax.f32 %v675_v57, 0.0 }
 0x115   : > { %902 = vmatmul.f32.gmra.mxu2 %v808_v58 }
 0x116   : > { %v516_v59 = vpop.f32.mrf.mxu0 }
 0x117   : > { %v677_v60 = vpop.f32.mrf.mxu1  ;;  %v517_v63 = vadd.f32 %v1710_v16, %v516_v59 }
 0x119   : > { %v678_v0 = vadd.f32 %v677_v60, %v517_v63  ;;  %563 = vmatmul.f32.gmra.mxu0 %v393_v61  ;;  %v411_v61 = vld [vmem:[%s1665_s22 + $0x1f0] sm:$0xff] }
 0x11a   : > { %724 = vmatmul.f32.gmra.mxu1 %v394_v62  ;;  %v412_v62 = vld [vmem:[%s1665_s22 + $0x1f8] sm:$0xff] }
 0x11b   : > { %v809_v1 = vmax.f32 %v678_v0, 0.0 }
 0x11d   : > { %905 = vmatmul.f32.gmra.mxu2 %v809_v1 }
 0x11e   : > { %v519_v2 = vpop.f32.mrf.mxu0 }
 0x11f   : > { %v680_v3 = vpop.f32.mrf.mxu1  ;;  %v520_v6 = vadd.f32 %v1710_v16, %v519_v2 }
 0x121   : > { %v681_v7 = vadd.f32 %v680_v3, %v520_v6  ;;  %566 = vmatmul.f32.gmra.mxu0 %v395_v4  ;;  %v413_v4 = vld [vmem:[%s1665_s22 + $0x200] sm:$0xff] }
 0x122   : > { %727 = vmatmul.f32.gmra.mxu1 %v396_v5  ;;  %v414_v5 = vld [vmem:[%s1665_s22 + $0x208] sm:$0xff] }
 0x123   : > { %v810_v8 = vmax.f32 %v681_v7, 0.0 }
 0x125   : > { %908 = vmatmul.f32.gmra.mxu2 %v810_v8 }
 0x126   : > { %v522_v9 = vpop.f32.mrf.mxu0 }
 0x127   : > { %v683_v10 = vpop.f32.mrf.mxu1  ;;  %v523_v13 = vadd.f32 %v1710_v16, %v522_v9 }
 0x129   : > { %v684_v14 = vadd.f32 %v683_v10, %v523_v13  ;;  %569 = vmatmul.f32.gmra.mxu0 %v397_v11  ;;  %v415_v11 = vld [vmem:[%s1665_s22 + $0x210] sm:$0xff] }
 0x12a   : > { %730 = vmatmul.f32.gmra.mxu1 %v398_v12  ;;  %v416_v12 = vld [vmem:[%s1665_s22 + $0x218] sm:$0xff] }
 0x12b   : > { %v811_v15 = vmax.f32 %v684_v14, 0.0 }
 0x12d   : > { %911 = vmatmul.f32.gmra.mxu2 %v811_v15 }
 0x12e   : > { %v525_v17 = vpop.f32.mrf.mxu0 }
 0x12f   : > { %v686_v18 = vpop.f32.mrf.mxu1  ;;  %v526_v21 = vadd.f32 %v1710_v16, %v525_v17 }
 0x131   : > { %v687_v22 = vadd.f32 %v686_v18, %v526_v21  ;;  %572 = vmatmul.f32.gmra.mxu0 %v399_v19  ;;  %v418_v21 = vld [vmem:[%s1665_s22 + $0x228] sm:$0xff] }
 0x132   : > { %733 = vmatmul.f32.gmra.mxu1 %v400_v20  ;;  %v417_v20 = vld [vmem:[%s1665_s22 + $0x220] sm:$0xff] }
 0x133   : > { %v812_v23 = vmax.f32 %v687_v22, 0.0 }
 0x135   : > { %914 = vmatmul.f32.gmra.mxu2 %v812_v23 }
 0x136   : > { %v528_v24 = vpop.f32.mrf.mxu0 }
 0x137   : > { %v689_v25 = vpop.f32.mrf.mxu1  ;;  %v529_v28 = vadd.f32 %v1710_v16, %v528_v24 }
 0x139   : > { %v690_v29 = vadd.f32 %v689_v25, %v529_v28  ;;  %575 = vmatmul.f32.gmra.mxu0 %v401_v26  ;;  %v419_v28 = vld [vmem:[%s1665_s22 + $0x230] sm:$0xff] }
 0x13a   : > { %736 = vmatmul.f32.gmra.mxu1 %v402_v27 }
 0x13b   : > { %v813_v30 = vmax.f32 %v690_v29, 0.0  ;;  %v420_v29 = vld [vmem:[%s1665_s22 + $0x238] sm:$0xff] }
 0x13d   : > { %917 = vmatmul.f32.gmra.mxu2 %v813_v30 }
 0x13e   : > { %v531_v31 = vpop.f32.mrf.mxu0 }
 0x13f   : > { %v692_v32 = vpop.f32.mrf.mxu1  ;;  %v532_v35 = vadd.f32 %v1710_v16, %v531_v31 }
 0x141   : > { %v693_v36 = vadd.f32 %v692_v32, %v532_v35  ;;  %578 = vmatmul.f32.gmra.mxu0 %v403_v33 }
 0x142   : > { %739 = vmatmul.f32.gmra.mxu1 %v404_v34 }
 0x143   : > { %v814_v37 = vmax.f32 %v693_v36, 0.0  ;;  %v421_v36 = vld [vmem:[%s1665_s22 + $0x240] sm:$0xff] }
 0x145   : > { %920 = vmatmul.f32.gmra.mxu2 %v814_v37  ;;  %v422_v37 = vld [vmem:[%s1665_s22 + $0x248] sm:$0xff] }
 0x146   : > { %v534_v38 = vpop.f32.mrf.mxu0 }
 0x147   : > { %v695_v39 = vpop.f32.mrf.mxu1  ;;  %v535_v42 = vadd.f32 %v1710_v16, %v534_v38 }
 0x149   : > { %v696_v43 = vadd.f32 %v695_v39, %v535_v42  ;;  %581 = vmatmul.f32.gmra.mxu0 %v405_v40 }
 0x14a   : > { %742 = vmatmul.f32.gmra.mxu1 %v406_v41 }
 0x14b   : > { %v815_v44 = vmax.f32 %v696_v43, 0.0 }
 0x14d   : > { %923 = vmatmul.f32.gmra.mxu2 %v815_v44  ;;  %v423_v44 = vld [vmem:[%s1665_s22 + $0x250] sm:$0xff] }
 0x14e   : > { %v537_v45 = vpop.f32.mrf.mxu0 }
 0x14f   : > { %v698_v46 = vpop.f32.mrf.mxu1  ;;  %v538_v49 = vadd.f32 %v1710_v16, %v537_v45  ;;  %v424_v45 = vld [vmem:[%s1665_s22 + $0x258] sm:$0xff] }
 0x151   : > { %v699_v50 = vadd.f32 %v698_v46, %v538_v49  ;;  %584 = vmatmul.f32.gmra.mxu0 %v407_v47 }
 0x152   : > { %745 = vmatmul.f32.gmra.mxu1 %v408_v48 }
 0x153   : > { %v816_v51 = vmax.f32 %v699_v50, 0.0 }
 0x155   : > { %926 = vmatmul.f32.gmra.mxu2 %v816_v51 }
 0x156   : > { %v540_v52 = vpop.f32.mrf.mxu0 }
 0x157   : > { %v701_v53 = vpop.f32.mrf.mxu1  ;;  %v541_v56 = vadd.f32 %v1710_v16, %v540_v52  ;;  %v425_v52 = vld [vmem:[%s1665_s22 + $0x260] sm:$0xff] }
 0x159   : > { %v702_v57 = vadd.f32 %v701_v53, %v541_v56  ;;  %587 = vmatmul.f32.gmra.mxu0 %v409_v54  ;;  %v426_v53 = vld [vmem:[%s1665_s22 + $0x268] sm:$0xff] }
 0x15a   : > { %748 = vmatmul.f32.gmra.mxu1 %v410_v55 }
 0x15b   : > { %v817_v58 = vmax.f32 %v702_v57, 0.0 }
 0x15d   : > { %929 = vmatmul.f32.gmra.mxu2 %v817_v58 }
 0x15e   : > { %v543_v59 = vpop.f32.mrf.mxu0 }
 0x15f   : > { %v704_v60 = vpop.f32.mrf.mxu1  ;;  %v544_v63 = vadd.f32 %v1710_v16, %v543_v59 }
 0x161   : > { %v705_v0 = vadd.f32 %v704_v60, %v544_v63  ;;  %590 = vmatmul.f32.gmra.mxu0 %v411_v61  ;;  %v427_v60 = vld [vmem:[%s1665_s22 + $0x270] sm:$0xff]  ;;  %v428_v61 = vld [vmem:[%s1665_s22 + $0x278] sm:$0xff] }
 0x162   : > { %751 = vmatmul.f32.gmra.mxu1 %v412_v62 }
 0x163   : > { %v818_v1 = vmax.f32 %v705_v0, 0.0 }
 0x165   : > { %932 = vmatmul.f32.gmra.mxu2 %v818_v1 }
 0x166   : > { %v546_v2 = vpop.f32.mrf.mxu0 }
 0x167   : > { %v707_v3 = vpop.f32.mrf.mxu1  ;;  %v547_v6 = vadd.f32 %v1710_v16, %v546_v2 }
 0x169   : > { %v708_v7 = vadd.f32 %v707_v3, %v547_v6  ;;  %593 = vmatmul.f32.gmra.mxu0 %v413_v4  ;;  %v429_v4 = vld [vmem:[%s1665_s22 + $0x280] sm:$0xff] }
 0x16a   : > { %754 = vmatmul.f32.gmra.mxu1 %v414_v5  ;;  %v430_v5 = vld [vmem:[%s1665_s22 + $0x288] sm:$0xff] }
 0x16b   : > { %v819_v8 = vmax.f32 %v708_v7, 0.0 }
 0x16d   : > { %935 = vmatmul.f32.gmra.mxu2 %v819_v8 }
 0x16e   : > { %v549_v9 = vpop.f32.mrf.mxu0 }
 0x16f   : > { %v710_v10 = vpop.f32.mrf.mxu1  ;;  %v550_v13 = vadd.f32 %v1710_v16, %v549_v9 }
 0x170   : > { %v1766_v14 = vpop.f32.mrf.mxu2 }
 0x171   : > { %v711_v15 = vadd.f32 %v710_v10, %v550_v13  ;;  %596 = vmatmul.f32.gmra.mxu0 %v415_v11  ;;  %v432_v13 = vld [vmem:[%s1665_s22 + $0x298] sm:$0xff] }
 0x172   : > { %757 = vmatmul.f32.gmra.mxu1 %v416_v12  ;;  %v431_v12 = vld [vmem:[%s1665_s22 + $0x290] sm:$0xff] }
 0x173   : > { %v820_v17 = vmax.f32 %v711_v15, 0.0 }
 0x175   : > { %938 = vmatmul.f32.gmra.mxu2 %v820_v17 }
 0x176   : > { %v552_v18 = vpop.f32.mrf.mxu0 }
 0x177   : > { %v713_v19 = vpop.f32.mrf.mxu1  ;;  %v553_v22 = vadd.f32 %v1710_v16, %v552_v18 }
 0x178   : > { %v1771_v23 = vpop.f32.mrf.mxu2 }
 0x179   : > { %v714_v24 = vadd.f32 %v713_v19, %v553_v22  ;;  %599 = vmatmul.f32.gmra.mxu0 %v417_v20  ;;  %v433_v22 = vld [vmem:[%s1665_s22 + $0x2a0] sm:$0xff] }
 0x17a   : > { %760 = vmatmul.f32.gmra.mxu1 %v418_v21 }
 0x17b   : > { %v821_v25 = vmax.f32 %v714_v24, 0.0  ;;  %v434_v24 = vld [vmem:[%s1665_s22 + $0x2a8] sm:$0xff] }
 0x17d   : > { %941 = vmatmul.f32.gmra.mxu2 %v821_v25 }
 0x17e   : > { %v555_v26 = vpop.f32.mrf.mxu0 }
 0x17f   : > { %v716_v27 = vpop.f32.mrf.mxu1  ;;  %v556_v30 = vadd.f32 %v1710_v16, %v555_v26 }
 0x180   : > { %v1776_v31 = vpop.f32.mrf.mxu2 }
 0x181   : > { %v717_v32 = vadd.f32 %v716_v27, %v556_v30  ;;  %602 = vmatmul.f32.gmra.mxu0 %v419_v28 }
 0x182   : > { %763 = vmatmul.f32.gmra.mxu1 %v420_v29 }
 0x183   : > { %v822_v33 = vmax.f32 %v717_v32, 0.0  ;;  %v435_v32 = vld [vmem:[%s1665_s22 + $0x2b0] sm:$0xff] }
 0x185   : > { %944 = vmatmul.f32.gmra.mxu2 %v822_v33  ;;  %v436_v33 = vld [vmem:[%s1665_s22 + $0x2b8] sm:$0xff] }
 0x186   : > { %v558_v34 = vpop.f32.mrf.mxu0 }
 0x187   : > { %v719_v35 = vpop.f32.mrf.mxu1  ;;  %v559_v38 = vadd.f32 %v1710_v16, %v558_v34 }
 0x188   : > { %v1781_v39 = vpop.f32.mrf.mxu2 }
 0x189   : > { %v720_v40 = vadd.f32 %v719_v35, %v559_v38  ;;  %605 = vmatmul.f32.gmra.mxu0 %v421_v36 }
 0x18a   : > { %766 = vmatmul.f32.gmra.mxu1 %v422_v37 }
 0x18b   : > { %v823_v41 = vmax.f32 %v720_v40, 0.0 }
 0x18d   : > { %947 = vmatmul.f32.gmra.mxu2 %v823_v41  ;;  %v437_v41 = vld [vmem:[%s1665_s22 + $0x2c0] sm:$0xff] }
 0x18e   : > { %v561_v42 = vpop.f32.mrf.mxu0 }
 0x18f   : > { %v722_v43 = vpop.f32.mrf.mxu1  ;;  %v562_v46 = vadd.f32 %v1710_v16, %v561_v42  ;;  %v438_v42 = vld [vmem:[%s1665_s22 + $0x2c8] sm:$0xff] }
 0x190   : > { %v1786_v47 = vpop.f32.mrf.mxu2 }
 0x191   : > { %v723_v48 = vadd.f32 %v722_v43, %v562_v46  ;;  %608 = vmatmul.f32.gmra.mxu0 %v423_v44 }
 0x192   : > { %769 = vmatmul.f32.gmra.mxu1 %v424_v45 }
 0x193   : > { %v824_v49 = vmax.f32 %v723_v48, 0.0 }
 0x195   : > { %950 = vmatmul.f32.gmra.mxu2 %v824_v49 }
 0x196   : > { %v564_v50 = vpop.f32.mrf.mxu0 }
 0x197   : > { %v725_v51 = vpop.f32.mrf.mxu1  ;;  %v565_v54 = vadd.f32 %v1710_v16, %v564_v50  ;;  %v439_v50 = vld [vmem:[%s1665_s22 + $0x2d0] sm:$0xff] }
 0x198   : > { %v1791_v55 = vpop.f32.mrf.mxu2 }
 0x199   : > { %v726_v56 = vadd.f32 %v725_v51, %v565_v54  ;;  %611 = vmatmul.f32.gmra.mxu0 %v425_v52  ;;  %v440_v51 = vld [vmem:[%s1665_s22 + $0x2d8] sm:$0xff] }
 0x19a   : > { %772 = vmatmul.f32.gmra.mxu1 %v426_v53 }
 0x19b   : > { %v825_v57 = vmax.f32 %v726_v56, 0.0 }
 0x19d   : > { %953 = vmatmul.f32.gmra.mxu2 %v825_v57 }
 0x19e   : > { %v567_v58 = vpop.f32.mrf.mxu0 }
 0x19f   : > { %v728_v59 = vpop.f32.mrf.mxu1  ;;  %v568_v62 = vadd.f32 %v1710_v16, %v567_v58 }
 0x1a0   : > { %v1796_v63 = vpop.f32.mrf.mxu2 }
 0x1a1   : > { %v729_v0 = vadd.f32 %v728_v59, %v568_v62  ;;  %614 = vmatmul.f32.gmra.mxu0 %v427_v60  ;;  %v441_v59 = vld [vmem:[%s1665_s22 + $0x2e0] sm:$0xff]  ;;  %v442_v60 = vld [vmem:[%s1665_s22 + $0x2e8] sm:$0xff] }
 0x1a2   : > { %775 = vmatmul.f32.gmra.mxu1 %v428_v61 }
 0x1a3   : > { %v826_v1 = vmax.f32 %v729_v0, 0.0 }
 0x1a5   : > { %956 = vmatmul.f32.gmra.mxu2 %v826_v1 }
 0x1a6   : > { %v570_v2 = vpop.f32.mrf.mxu0 }
 0x1a7   : > { %v731_v3 = vpop.f32.mrf.mxu1  ;;  %v571_v6 = vadd.f32 %v1710_v16, %v570_v2 }
 0x1a8   : > { %v1801_v7 = vpop.f32.mrf.mxu2 }
 0x1a9   : > { %v732_v8 = vadd.f32 %v731_v3, %v571_v6  ;;  %617 = vmatmul.f32.gmra.mxu0 %v429_v4  ;;  %v443_v4 = vld [vmem:[%s1665_s22 + $0x2f0] sm:$0xff] }
 0x1aa   : > { %778 = vmatmul.f32.gmra.mxu1 %v430_v5  ;;  %v444_v5 = vld [vmem:[%s1665_s22 + $0x2f8] sm:$0xff] }
 0x1ab   : > { %v827_v9 = vmax.f32 %v732_v8, 0.0 }
 0x1ad   : > { %959 = vmatmul.f32.gmra.mxu2 %v827_v9 }
 0x1ae   : > { %v573_v10 = vpop.f32.mrf.mxu0 }
 0x1af   : > { %v734_v11 = vpop.f32.mrf.mxu1  ;;  %v574_v15 = vadd.f32 %v1710_v16, %v573_v10 }
 0x1b0   : > { %v1806_v17 = vpop.f32.mrf.mxu2 }
 0x1b1   : > { %v735_v18 = vadd.f32 %v734_v11, %v574_v15  ;;  %620 = vmatmul.f32.gmra.mxu0 %v431_v12 }
 0x1b2   : > { %781 = vmatmul.f32.gmra.mxu1 %v432_v13  ;;  %v1835_v13 = vld [vmem:[%s1980_s4] ss:$0 sm:$0xff] }
 0x1b3   : > { %v828_v19 = vmax.f32 %v735_v18, 0.0 }
 0x1b5   : > { %962 = vmatmul.f32.gmra.mxu2 %v828_v19 }
 0x1b6   : > { %v576_v20 = vpop.f32.mrf.mxu0 }
 0x1b7   : > { %v737_v21 = vpop.f32.mrf.mxu1  ;;  %v577_v25 = vadd.f32 %v1710_v16, %v576_v20 }
 0x1b8   : > { %v1811_v26 = vpop.f32.mrf.mxu2 }
 0x1b9   : > { %v738_v27 = vadd.f32 %v737_v21, %v577_v25  ;;  %623 = vmatmul.f32.gmra.mxu0 %v433_v22 }
 0x1ba   : > { %784 = vmatmul.f32.gmra.mxu1 %v434_v24 }
 0x1bb   : > { %v829_v28 = vmax.f32 %v738_v27, 0.0 }
 0x1bd   : > { %965 = vmatmul.f32.gmra.mxu2 %v829_v28 }
 0x1be   : > { %v579_v29 = vpop.f32.mrf.mxu0 }
 0x1bf   : > { %v740_v30 = vpop.f32.mrf.mxu1  ;;  %v580_v34 = vadd.f32 %v1710_v16, %v579_v29 }
 0x1c0   : > { %v1816_v35 = vpop.f32.mrf.mxu2 }
 0x1c1   : > { %v741_v36 = vadd.f32 %v740_v30, %v580_v34  ;;  %626 = vmatmul.f32.gmra.mxu0 %v435_v32 }
 0x1c2   : > { %787 = vmatmul.f32.gmra.mxu1 %v436_v33 }
 0x1c3   : > { %v830_v37 = vmax.f32 %v741_v36, 0.0 }
 0x1c5   : > { %968 = vmatmul.f32.gmra.mxu2 %v830_v37 }
 0x1c6   : > { %v582_v38 = vpop.f32.mrf.mxu0 }
 0x1c7   : > { %v743_v40 = vpop.f32.mrf.mxu1  ;;  %v583_v43 = vadd.f32 %v1710_v16, %v582_v38 }
 0x1c8   : > { %v1821_v44 = vpop.f32.mrf.mxu2 }
 0x1c9   : > { %v744_v45 = vadd.f32 %v743_v40, %v583_v43  ;;  %629 = vmatmul.f32.gmra.mxu0 %v437_v41  ;;  %v922_v41 = vadd.f32 %v1835_v13, %v1821_v44 }
 0x1ca   : > { %790 = vmatmul.f32.gmra.mxu1 %v438_v42 }
 0x1cb   : > { %v831_v46 = vmax.f32 %v744_v45, 0.0 }
 0x1cd   : > { %971 = vmatmul.f32.gmra.mxu2 %v831_v46 }
 0x1ce   : > { %v585_v48 = vpop.f32.mrf.mxu0 }
 0x1cf   : > { %v746_v49 = vpop.f32.mrf.mxu1  ;;  %v586_v52 = vadd.f32 %v1710_v16, %v585_v48  ;;  %v919_v48 = vadd.f32 %v1835_v13, %v1816_v35 }
 0x1d0   : > { %v924_v53 = vpop.f32.mrf.mxu2 }
 0x1d1   : > { %v747_v54 = vadd.f32 %v746_v49, %v586_v52  ;;  %632 = vmatmul.f32.gmra.mxu0 %v439_v50  ;;  %v925_v34 = vadd.f32 %v1835_v13, %v924_v53  ;;  %v1043_v50 = vmax.f32 %v922_v41, 0.0  ;;  %v916_v53 = vadd.f32 %v1835_v13, %v1811_v26 }
 0x1d2   : > { %793 = vmatmul.f32.gmra.mxu1 %v440_v51 }
 0x1d3   : > { %v832_v56 = vmax.f32 %v747_v54, 0.0  ;;  %v1044_v43 = vmax.f32 %v925_v34, 0.0  ;;  %v1042_v54 = vmax.f32 %v919_v48, 0.0 }
 0x1d5   : > { %974 = vmatmul.f32.gmra.mxu2 %v832_v56 }
 0x1d6   : > { %v588_v57 = vpop.f32.mrf.mxu0 }
 0x1d7   : > { %v749_v58 = vpop.f32.mrf.mxu1  ;;  %v589_v61 = vadd.f32 %v1710_v16, %v588_v57 }
 0x1d8   : > { %v927_v62 = vpop.f32.mrf.mxu2 }
 0x1d9   : > { %v750_v0 = vadd.f32 %v749_v58, %v589_v61  ;;  %635 = vmatmul.f32.gmra.mxu0 %v441_v59  ;;  %v928_v28 = vadd.f32 %v1835_v13, %v927_v62  ;;  %v913_v58 = vadd.f32 %v1835_v13, %v1806_v17  ;;  %v1041_v59 = vmax.f32 %v916_v53, 0.0 }
 0x1da   : > { %796 = vmatmul.f32.gmra.mxu1 %v442_v60  ;;  %v910_v62 = vadd.f32 %v1835_v13, %v1801_v7 }
 0x1db   : > { %v833_v1 = vmax.f32 %v750_v0, 0.0  ;;  %v1045_v37 = vmax.f32 %v928_v28, 0.0  ;;  %v1040_v0 = vmax.f32 %v913_v58, 0.0 }
 0x1dd   : > { %977 = vmatmul.f32.gmra.mxu2 %v833_v1 }
 0x1de   : > { %v591_v2 = vpop.f32.mrf.mxu0 }
 0x1df   : > { %v752_v3 = vpop.f32.mrf.mxu1  ;;  %v592_v6 = vadd.f32 %v1710_v16, %v591_v2 }
 0x1e0   : > { %v930_v8 = vpop.f32.mrf.mxu2 }
 0x1e1   : > { %v753_v9 = vadd.f32 %v752_v3, %v592_v6  ;;  %638 = vmatmul.f32.gmra.mxu0 %v443_v4  ;;  %v931_v21 = vadd.f32 %v1835_v13, %v930_v8  ;;  %v907_v3 = vadd.f32 %v1835_v13, %v1796_v63  ;;  %v1039_v4 = vmax.f32 %v910_v62, 0.0 }
 0x1e2   : > { %799 = vmatmul.f32.gmra.mxu1 %v444_v5  ;;  %v904_v8 = vadd.f32 %v1835_v13, %v1791_v55 }
 0x1e3   : > { %v834_v10 = vmax.f32 %v753_v9, 0.0  ;;  %v1046_v30 = vmax.f32 %v931_v21, 0.0  ;;  %v1038_v9 = vmax.f32 %v907_v3, 0.0 }
 0x1e5   : > { %980 = vmatmul.f32.gmra.mxu2 %v834_v10 }
 0x1e6   : > { %v594_v11 = vpop.f32.mrf.mxu0 }
 0x1e7   : > { %v755_v12 = vpop.f32.mrf.mxu1  ;;  %v595_v15 = vadd.f32 %v1710_v16, %v594_v11 }
 0x1e8   : > { %v933_v18 = vpop.f32.mrf.mxu2 }
 0x1e9   : > { %v756_v19 = vadd.f32 %v755_v12, %v595_v15  ;;  %v934_v20 = vadd.f32 %v1835_v13, %v933_v18  ;;  %v901_v12 = vadd.f32 %v1835_v13, %v1786_v47  ;;  %v1037_v15 = vmax.f32 %v904_v8, 0.0 }
 0x1eb   : > { %v835_v22 = vmax.f32 %v756_v19, 0.0  ;;  %v1047_v24 = vmax.f32 %v934_v20, 0.0  ;;  %v898_v20 = vadd.f32 %v1835_v13, %v1781_v39  ;;  %v1036_v21 = vmax.f32 %v901_v12, 0.0 }
 0x1ed   : > { %983 = vmatmul.f32.gmra.mxu2 %v835_v22  ;;  %1083 = vmatpush.xpose.msra.mxu3 %v1047_v24 }
 0x1ee   : > { %v597_v25 = vpop.f32.mrf.mxu0 }
 0x1ef   : > { %v758_v27 = vpop.f32.mrf.mxu1  ;;  %v598_v29 = vadd.f32 %v1710_v16, %v597_v25  ;;  %v895_v25 = vadd.f32 %v1835_v13, %v1776_v31 }
 0x1f0   : > { %v1842_v32 = vpop.f32.mrf.mxu2 }
 0x1f1   : > { %v759_v33 = vadd.f32 %v758_v27, %v598_v29  ;;  %1084 = vmatpush.xpose.msra.mxu3 %v1046_v30  ;;  %v1035_v27 = vmax.f32 %v898_v20, 0.0  ;;  %v892_v30 = vadd.f32 %v1835_v13, %v1771_v23 }
 0x1f3   : > { %v836_v36 = vmax.f32 %v759_v33, 0.0  ;;  %v1034_v33 = vmax.f32 %v895_v25, 0.0 }
 0x1f5   : > { %986 = vmatmul.f32.gmra.mxu2 %v836_v36  ;;  %1085 = vmatpush.xpose.msra.mxu3 %v1045_v37  ;;  %v889_v37 = vadd.f32 %v1835_v13, %v1766_v14 }
 0x1f6   : > { %v600_v38 = vpop.f32.mrf.mxu0 }
 0x1f7   : > { %v761_v40 = vpop.f32.mrf.mxu1  ;;  %v601_v42 = vadd.f32 %v1710_v16, %v600_v38  ;;  %v1033_v38 = vmax.f32 %v892_v30, 0.0 }
 0x1f8   : > { %v1848_v45 = vpop.f32.mrf.mxu2 }
 0x1f9   : > { %v762_v46 = vadd.f32 %v761_v40, %v601_v42  ;;  %1086 = vmatpush.xpose.msra.mxu3 %v1044_v43  ;;  %v1032_v43 = vmax.f32 %v889_v37, 0.0 }
 0x1fb   : > { %v837_v49 = vmax.f32 %v762_v46, 0.0 }
 0x1fd   : > { %989 = vmatmul.f32.gmra.mxu2 %v837_v49  ;;  %1087 = vmatpush.xpose.msra.mxu3 %v1043_v50 }
 0x1fe   : > { %v603_v51 = vpop.f32.mrf.mxu0 }
 0x1ff   : > { %v764_v52 = vpop.f32.mrf.mxu1  ;;  %v604_v44 = vadd.f32 %v1710_v16, %v603_v51 }
 0x200   : > { %v1855_v56 = vpop.f32.mrf.mxu2 }
 0x201   : > { %v765_v57 = vadd.f32 %v764_v52, %v604_v44  ;;  %1088 = vmatpush.xpose.msra.mxu3 %v1042_v54 }
 0x203   : > { %v838_v35 = vmax.f32 %v765_v57, 0.0 }
 0x205   : > { %992 = vmatmul.f32.gmra.mxu2 %v838_v35  ;;  %1089 = vmatpush.xpose.msra.mxu3 %v1041_v59 }
 0x206   : > { %v606_v60 = vpop.f32.mrf.mxu0 }
 0x207   : > { %v767_v61 = vpop.f32.mrf.mxu1  ;;  %v607_v26 = vadd.f32 %v1710_v16, %v606_v60 }
 0x208   : > { %v1862_v1 = vpop.f32.mrf.mxu2 }
 0x209   : > { %v768_v2 = vadd.f32 %v767_v61, %v607_v26  ;;  %1090 = vmatpush.xpose.msra.mxu3 %v1040_v0 }
 0x20b   : > { %v839_v17 = vmax.f32 %v768_v2, 0.0 }
 0x20d   : > { %995 = vmatmul.f32.gmra.mxu2 %v839_v17  ;;  %1091 = vmatpush.xpose.msra.mxu3 %v1039_v4 }
 0x20e   : > { %v609_v5 = vpop.f32.mrf.mxu0 }
 0x20f   : > { %v770_v6 = vpop.f32.mrf.mxu1  ;;  %v610_v7 = vadd.f32 %v1710_v16, %v609_v5 }
 0x210   : > { %v1869_v10 = vpop.f32.mrf.mxu2 }
 0x211   : > { %v771_v11 = vadd.f32 %v770_v6, %v610_v7  ;;  %1092 = vmatpush.xpose.msra.mxu3 %v1038_v9 }
 0x213   : > { %v840_v63 = vmax.f32 %v771_v11, 0.0 }
 0x215   : > { %998 = vmatmul.f32.gmra.mxu2 %v840_v63  ;;  %1093 = vmatpush.xpose.msra.mxu3 %v1037_v15 }
 0x216   : > { %v612_v18 = vpop.f32.mrf.mxu0 }
 0x217   : > { %v773_v19 = vpop.f32.mrf.mxu1  ;;  %v613_v55 = vadd.f32 %v1710_v16, %v612_v18 }
 0x218   : > { %v1876_v22 = vpop.f32.mrf.mxu2 }
 0x219   : > { %v774_v24 = vadd.f32 %v773_v19, %v613_v55  ;;  %1094 = vmatpush.xpose.msra.mxu3 %v1036_v21 }
 0x21b   : > { %v841_v47 = vmax.f32 %v774_v24, 0.0 }
 0x21d   : > { %1001 = vmatmul.f32.gmra.mxu2 %v841_v47  ;;  %1095 = vmatpush.xpose.msra.mxu3 %v1035_v27 }
 0x21e   : > { %v615_v28 = vpop.f32.mrf.mxu0 }
 0x21f   : > { %v776_v29 = vpop.f32.mrf.mxu1  ;;  %v616_v39 = vadd.f32 %v1710_v16, %v615_v28 }
 0x220   : > { %v1883_v34 = vpop.f32.mrf.mxu2 }
 0x221   : > { %v777_v36 = vadd.f32 %v776_v29, %v616_v39  ;;  %1096 = vmatpush.xpose.msra.mxu3 %v1034_v33 }
 0x223   : > { %v842_v31 = vmax.f32 %v777_v36, 0.0 }
 0x225   : > { %1004 = vmatmul.f32.gmra.mxu2 %v842_v31  ;;  %1097 = vmatpush.xpose.msra.mxu3 %v1033_v38 }
 0x226   : > { %v618_v40 = vpop.f32.mrf.mxu0 }
 0x227   : > { %v779_v41 = vpop.f32.mrf.mxu1  ;;  %v619_v42 = vadd.f32 %v1710_v16, %v618_v40 }
 0x228   : > { %v1888_v23 = vpop.f32.mrf.mxu2 }
 0x229   : > { %v780_v46 = vadd.f32 %v779_v41, %v619_v42  ;;  %1098 = vmatpush.xpose.msra.mxu3 %v1032_v43 }
 0x22b   : > { %v843_v48 = vmax.f32 %v780_v46, 0.0 }
 0x22d   : > { %1007 = vmatmul.f32.gmra.mxu2 %v843_v48 }
 0x22e   : > { %v621_v49 = vpop.f32.mrf.mxu0 }
 0x22f   : > { %v782_v50 = vpop.f32.mrf.mxu1  ;;  %v622_v51 = vadd.f32 %v1710_v16, %v621_v49 }
 0x230   : > { %v1891_v14 = vpop.f32.mrf.mxu2 }
 0x231   : > { %v783_v52 = vadd.f32 %v782_v50, %v622_v51 }
 0x233   : > { %v844_v53 = vmax.f32 %v783_v52, 0.0 }
 0x235   : > { %1010 = vmatmul.f32.gmra.mxu2 %v844_v53  ;;  %v961_v53 = vadd.f32 %v1835_v13, %v1891_v14  ;;  %v949_v14 = vadd.f32 %v1835_v13, %v1869_v10  ;;  %v937_v10 = vadd.f32 %v1835_v13, %v1842_v32 }
 0x236   : > { %v624_v44 = vpop.f32.mrf.mxu0 }
 0x237   : > { %v785_v54 = vpop.f32.mrf.mxu1  ;;  %v625_v57 = vadd.f32 %v1710_v16, %v624_v44 }
 0x238   : > { %v963_v58 = vpop.f32.mrf.mxu2 }
 0x239   : > { %v786_v35 = vadd.f32 %v785_v54, %v625_v57  ;;  %v964_v50 = vadd.f32 %v1835_v13, %v963_v58  ;;  %v958_v54 = vadd.f32 %v1835_v13, %v1888_v23  ;;  %v1056_v57 = vmax.f32 %v961_v53, 0.0 }
 0x23b   : > { %v845_v59 = vmax.f32 %v786_v35, 0.0  ;;  %v1057_v44 = vmax.f32 %v964_v50, 0.0  ;;  %v1055_v58 = vmax.f32 %v958_v54, 0.0 }
 0x23d   : > { %1013 = vmatmul.f32.gmra.mxu2 %v845_v59  ;;  %v955_v59 = vadd.f32 %v1835_v13, %v1883_v34  ;;  %v943_v34 = vadd.f32 %v1835_v13, %v1855_v56  ;;  %v1080_v56 = vld [vmem:[%s1981_s5] sm:$0x1] }
 0x23e   : > { %v627_v60 = vpop.f32.mrf.mxu0  ;;  %1099 = vmatmul.f32.vlgmr.msra.gmra.mxu3 %v1080_v56 }
 0x23f   : > { %v788_v61 = vpop.f32.mrf.mxu1  ;;  %v628_v62 = vadd.f32 %v1710_v16, %v627_v60  ;;  %v952_v60 = vadd.f32 %v1835_v13, %v1876_v22  ;;  %v940_v22 = vadd.f32 %v1835_v13, %v1848_v45 }
 0x240   : > { %v966_v26 = vpop.f32.mrf.mxu2 }
 0x241   : > { %v789_v0 = vadd.f32 %v788_v61, %v628_v62  ;;  %v967_v48 = vadd.f32 %v1835_v13, %v966_v26  ;;  %v1054_v61 = vmax.f32 %v955_v59, 0.0  ;;  %v1053_v23 = vmax.f32 %v952_v60, 0.0 }
 0x242   : > { %v946_v26 = vadd.f32 %v1835_v13, %v1862_v1  ;;  %v1048_v1 = vmax.f32 %v937_v10, 0.0 }
 0x243   : > { %v846_v2 = vmax.f32 %v789_v0, 0.0  ;;  %v1058_v51 = vmax.f32 %v967_v48, 0.0  ;;  %v1052_v0 = vmax.f32 %v949_v14, 0.0 }
 0x245   : > { %1016 = vmatmul.f32.gmra.mxu2 %v846_v2 }
 0x246   : > { %v630_v3 = vpop.f32.mrf.mxu0 }
 0x247   : > { %v791_v17 = vpop.f32.mrf.mxu1  ;;  %v631_v4 = vadd.f32 %v1710_v16, %v630_v3  ;;  %v1051_v3 = vmax.f32 %v946_v26, 0.0 }
 0x248   : > { %v969_v5 = vpop.f32.mrf.mxu2 }
 0x249   : > { %v792_v6 = vadd.f32 %v791_v17, %v631_v4  ;;  %v970_v42 = vadd.f32 %v1835_v13, %v969_v5  ;;  %v1050_v17 = vmax.f32 %v943_v34, 0.0  ;;  %v1049_v5 = vmax.f32 %v940_v22, 0.0 }
 0x24b   : > { %v847_v8 = vmax.f32 %v792_v6, 0.0  ;;  %v1059_v49 = vmax.f32 %v970_v42, 0.0 }
 0x24d   : > { %1019 = vmatmul.f32.gmra.mxu2 %v847_v8 }
 0x24e   : > { %v633_v7 = vpop.f32.mrf.mxu0 }
 0x24f   : > { %v794_v9 = vpop.f32.mrf.mxu1  ;;  %v634_v11 = vadd.f32 %v1710_v16, %v633_v7 }
 0x250   : > { %v972_v12 = vpop.f32.mrf.mxu2 }
 0x251   : > { %v795_v63 = vadd.f32 %v794_v9, %v634_v11  ;;  %v973_v41 = vadd.f32 %v1835_v13, %v972_v12 }
 0x253   : > { %v848_v15 = vmax.f32 %v795_v63, 0.0  ;;  %v1060_v43 = vmax.f32 %v973_v41, 0.0 }
 0x255   : > { %1022 = vmatmul.f32.gmra.mxu2 %v848_v15 }
 0x256   : > { %v636_v18 = vpop.f32.mrf.mxu0 }
 0x257   : > { %v797_v19 = vpop.f32.mrf.mxu1  ;;  %v637_v20 = vadd.f32 %v1710_v16, %v636_v18 }
 0x258   : > { %v975_v55 = vpop.f32.mrf.mxu2 }
 0x259   : > { %v798_v21 = vadd.f32 %v797_v19, %v637_v20  ;;  %v976_v31 = vadd.f32 %v1835_v13, %v975_v55 }
 0x25b   : > { %v849_v24 = vmax.f32 %v798_v21, 0.0 }
 0x25d   : > { %1025 = vmatmul.f32.gmra.mxu2 %v849_v24 }
 0x25e   : > { %v639_v25 = vpop.f32.mrf.mxu0 }
 0x25f   : > { %v800_v47 = vpop.f32.mrf.mxu1  ;;  %v640_v27 = vadd.f32 %v1710_v16, %v639_v25  ;;  %v1061_v16 = vmax.f32 %v976_v31, 0.0 }
 0x260   : > { %v978_v28 = vpop.f32.mrf.mxu2 }
 0x261   : > { %v801_v29 = vadd.f32 %v800_v47, %v640_v27  ;;  %v979_v36 = vadd.f32 %v1835_v13, %v978_v28 }
 0x263   : > { %v850_v30 = vmax.f32 %v801_v29, 0.0  ;;  %v1062_v38 = vmax.f32 %v979_v36, 0.0 }
 0x265   : > { %1028 = vmatmul.f32.gmra.mxu2 %v850_v30 }
 0x268   : > { %v981_v39 = vpop.f32.mrf.mxu2 }
 0x269   : > { %v982_v33 = vadd.f32 %v1835_v13, %v981_v39 }
 0x26b   : > { %v1063_v37 = vmax.f32 %v982_v33, 0.0 }
 0x26d   : > { %1103 = vmatpush.xpose.msrb.mxu3 %v1063_v37 }
 0x270   : > { %v1902_v40 = vpop.f32.mrf.mxu2 }
 0x271   : > { %1104 = vmatpush.xpose.msrb.mxu3 %v1062_v38  ;;  %v985_v54 = vadd.f32 %v1835_v13, %v1902_v40 }
 0x273   : > { %v1064_v59 = vmax.f32 %v985_v54, 0.0 }
 0x275   : > { %1105 = vmatpush.xpose.msrb.mxu3 %v1061_v16 }
 0x278   : > { %v1906_v46 = vpop.f32.mrf.mxu2 }
 0x279   : > { %1106 = vmatpush.xpose.msrb.mxu3 %v1060_v43  ;;  %v988_v53 = vadd.f32 %v1835_v13, %v1906_v46 }
 0x27d   : > { %1107 = vmatpush.xpose.msrb.mxu3 %v1059_v49 }
 0x280   : > { %v1910_v52 = vpop.f32.mrf.mxu2 }
 0x281   : > { %1108 = vmatpush.xpose.msrb.mxu3 %v1058_v51  ;;  %v991_v50 = vadd.f32 %v1835_v13, %v1910_v52 }
 0x285   : > { %1109 = vmatpush.xpose.msrb.mxu3 %v1057_v44  ;;  %v1066_v44 = vmax.f32 %v991_v50, 0.0 }
 0x288   : > { %v1916_v35 = vpop.f32.mrf.mxu2 }
 0x289   : > { %1110 = vmatpush.xpose.msrb.mxu3 %v1056_v57  ;;  %v994_v48 = vadd.f32 %v1835_v13, %v1916_v35  ;;  %v1065_v57 = vmax.f32 %v988_v53, 0.0 }
 0x28b   : > { %v1067_v51 = vmax.f32 %v994_v48, 0.0 }
 0x28d   : > { %1111 = vmatpush.xpose.msrb.mxu3 %v1055_v58  ;;  %v1082_v58 = vstv %s1081_s23 }
 0x290   : > { %v1922_v62 = vpop.f32.mrf.mxu2 }
 0x291   : > { %1112 = vmatpush.xpose.msrb.mxu3 %v1054_v61  ;;  %v997_v42 = vadd.f32 %v1835_v13, %v1922_v62 }
 0x293   : > { %v1068_v49 = vmax.f32 %v997_v42, 0.0 }
 0x295   : > { %1113 = vmatpush.xpose.msrb.mxu3 %v1053_v23 }
 0x298   : > { %v999_v2 = vpop.f32.mrf.mxu2 }
 0x299   : > { %1114 = vmatpush.xpose.msrb.mxu3 %v1052_v0  ;;  %v1000_v41 = vadd.f32 %v1835_v13, %v999_v2 }
 0x29b   : > { %v1069_v43 = vmax.f32 %v1000_v41, 0.0 }
 0x29d   : > { %1115 = vmatpush.xpose.msrb.mxu3 %v1051_v3 }
 0x2a0   : > { %v1002_v4 = vpop.f32.mrf.mxu2 }
 0x2a1   : > { %1116 = vmatpush.xpose.msrb.mxu3 %v1050_v17  ;;  %v1003_v31 = vadd.f32 %v1835_v13, %v1002_v4 }
 0x2a3   : > { %v1070_v16 = vmax.f32 %v1003_v31, 0.0 }
 0x2a5   : > { %1117 = vmatpush.xpose.msrb.mxu3 %v1049_v5 }
 0x2a8   : > { %v1005_v6 = vpop.f32.mrf.mxu2 }
 0x2a9   : > { %1118 = vmatpush.xpose.msrb.mxu3 %v1048_v1  ;;  %v1006_v36 = vadd.f32 %v1835_v13, %v1005_v6 }
 0x2ab   : > { %v1071_v38 = vmax.f32 %v1006_v36, 0.0 }
 0x2ac   : > { %1119 = vmatmul.f32.vlgmr.msrb.gmra.mxu3 %v1080_v56 }
 0x2b0   : > { %v1008_v8 = vpop.f32.mrf.mxu2 }
 0x2b1   : > { %v1009_v39 = vadd.f32 %v1835_v13, %v1008_v8 }
 0x2b3   : > { %v1072_v37 = vmax.f32 %v1009_v39, 0.0 }
 0x2b8   : > { %v1011_v7 = vpop.f32.mrf.mxu2 }
 0x2b9   : > { %v1012_v29 = vadd.f32 %v1835_v13, %v1011_v7 }
 0x2bb   : > { %v1073_v33 = vmax.f32 %v1012_v29, 0.0 }
 0x2c0   : > { %v1014_v45 = vpop.f32.mrf.mxu2 }
 0x2c1   : > { %v1015_v27 = vadd.f32 %v1835_v13, %v1014_v45  ;;  %v1100_v35 = vpop.f32.mrf.mxu3 }
 0x2c2   : > { %v1101_v62 = vadd.f32 %v1100_v35, %v1082_v58 }
 0x2c3   : > { %v1074_v30 = vmax.f32 %v1015_v27, 0.0 }
 0x2c4   : > { %v1146_v23 = vand.u32 2147483647, %v1101_v62  ;;  %v1143_v45 = vmax.f32 %v1101_v62, 0.0 }
 0x2c6   : > { %v1149_v26 = vsub.f32 0.0, %v1146_v23 }
 0x2c8   : > { %v1017_v9 = vpop.f32.mrf.mxu2  ;;  %v1152_v0 = vmul.f32 1.442695, %v1149_v26 }
 0x2c9   : > { %v1018_v25 = vadd.f32 %v1835_v13, %v1017_v9 }
 0x2cb   : > { %v1075_v28 = vmax.f32 %v1018_v25, 0.0 }
 0x2d0   : > { %v1020_v11 = vpop.f32.mrf.mxu2 }
 0x2d1   : > { %v1021_v21 = vadd.f32 %v1835_v13, %v1020_v11 }
 0x2d3   : > { %v1076_v47 = vmax.f32 %v1021_v21, 0.0 }
 0x2d8   : > { %v1023_v12 = vpop.f32.mrf.mxu2 }
 0x2d9   : > { %v1024_v20 = vadd.f32 %v1835_v13, %v1023_v12 }
 0x2db   : > { %v1077_v24 = vmax.f32 %v1024_v20, 0.0 }
 0x2e0   : > { %v1026_v63 = vpop.f32.mrf.mxu2 }
 0x2e1   : > { %v1027_v18 = vadd.f32 %v1835_v13, %v1026_v63 }
 0x2e3   : > { %v1078_v55 = vmax.f32 %v1027_v18, 0.0 }
 0x2e8   : > { %v1029_v15 = vpop.f32.mrf.mxu2 }
 0x2e9   : > { %v1030_v32 = vadd.f32 %v1835_v13, %v1029_v15 }
 0x2eb   : > { %v1079_v19 = vmax.f32 %v1030_v32, 0.0  ;;  %v1180_v32 = vlaneseq }
 0x2ed   : > { %1123 = vmatpush.xpose.msra.mxu3 %v1079_v19  ;;  %vm1182_vm2 = vcmp.lt.s32.totalorder %v1180_v32, 384 }
 0x2f1   : > { %1124 = vmatpush.xpose.msra.mxu3 %v1078_v55 }
 0x2f5   : > { %1125 = vmatpush.xpose.msra.mxu3 %v1077_v24 }
 0x2f9   : > { %1126 = vmatpush.xpose.msra.mxu3 %v1076_v47 }
 0x2fd   : > { %1127 = vmatpush.xpose.msra.mxu3 %v1075_v28 }
 0x301   : > { %1128 = vmatpush.xpose.msra.mxu3 %v1074_v30 }
 0x305   : > { %1129 = vmatpush.xpose.msra.mxu3 %v1073_v33 }
 0x309   : > { %1130 = vmatpush.xpose.msra.mxu3 %v1072_v37 }
 0x30d   : > { %1131 = vmatpush.xpose.msra.mxu3 %v1071_v38 }
 0x311   : > { %1132 = vmatpush.xpose.msra.mxu3 %v1070_v16 }
 0x315   : > { %1133 = vmatpush.xpose.msra.mxu3 %v1069_v43 }
 0x319   : > { %1134 = vmatpush.xpose.msra.mxu3 %v1068_v49 }
 0x31d   : > { %1135 = vmatpush.xpose.msra.mxu3 %v1067_v51 }
 0x321   : > { %1136 = vmatpush.xpose.msra.mxu3 %v1066_v44 }
 0x325   : > { %1137 = vmatpush.xpose.msra.mxu3 %v1065_v57 }
 0x329   : > { %1138 = vmatpush.xpose.msra.mxu3 %v1064_v59 }
 0x32c   : > { %1139 = vmatmul.f32.vlgmr.msra.gmra.mxu3 %v1080_v56 }
 0x32f   : > { %v1120_v60 = vpop.f32.mrf.mxu3 }
 0x330   : > { %v1121_v52 = vadd.f32 %v1120_v60, %v1082_v58 }
 0x332   : > { %v1147_v61 = vand.u32 2147483647, %v1121_v52  ;;  %v1144_v56 = vmax.f32 %v1121_v52, 0.0 }
 0x334   : > { %v1150_v14 = vsub.f32 0.0, %v1147_v61 }
 0x336   : > { %v1154_v46 = vmul.f32 1.442695, %v1150_v14 }
 0x338   : > { %1349 = vpow2.f32 %v1154_v46 }
 0x339   : > { %1351 = vpow2.f32 %v1152_v0 }
 0x33e   : > { %v1350_v40 = vpop.eup %1349 }
 0x33f   : > { %v1159_v3 = vadd.f32 1.0, %v1350_v40  ;;  %v1352_v17 = vpop.eup %1351 }
 0x340   : > { %v1158_v10 = vadd.f32 1.0, %v1352_v17 }
 0x341   : > { %1353 = vlog2.f32 %v1159_v3 }
 0x347   : > { %v1354_v5 = vpop.eup %1353 }
 0x348   : > { %v1164_v8 = vmul.f32 0.6931472, %v1354_v5 }
 0x34a   : > { %v1168_v11 = vadd.f32 %v1164_v8, %v1144_v56 }
 0x34c   : > { %v1173_v19 = vrot.slane %v1168_v11, 7 }
 0x3af   : > { %v1140_v13 = vpop.f32.mrf.mxu3 }
 0x3b0   : > { %v1141_v2 = vadd.f32 %v1140_v13, %v1082_v58 }
 0x3b2   : > { %v1148_v34 = vand.u32 2147483647, %v1141_v2  ;;  %v1145_v63 = vmax.f32 %v1141_v2, 0.0 }
 0x3b4   : > { %v1151_v22 = vsub.f32 0.0, %v1148_v34 }
 0x3b6   : > { %v1156_v4 = vmul.f32 1.442695, %v1151_v22 }
 0x3b8   : > { %1355 = vpow2.f32 %v1156_v4 }
 0x3b9   : > { %1357 = vlog2.f32 %v1158_v10 }
 0x3be   : > { %v1356_v1 = vpop.eup %1355 }
 0x3bf   : > { %v1160_v6 = vadd.f32 1.0, %v1356_v1  ;;  %v1358_v7 = vpop.eup %1357 }
 0x3c0   : > { %v1162_v9 = vmul.f32 0.6931472, %v1358_v7 }
 0x3c1   : > { %1359 = vlog2.f32 %v1160_v6 }
 0x3c2   : > { %v1167_v18 = vadd.f32 %v1162_v9, %v1143_v45 }
 0x3c4   : > { %v1176_v21 = vsel %vm1175_vm0, %v1167_v18, %v1173_v19 }
 0x3c7   : > { %v1360_v12 = vpop.eup %1359 }
 0x3c8   : > { %v1166_v15 = vmul.f32 0.6931472, %v1360_v12 }
 0x3ca   : > { %v1169_v20 = vadd.f32 %v1166_v15, %v1145_v63 }
 0x3cc   : > { %v1174_v55 = vrot.slane %v1169_v20, 6 }
 0x3ce   : > { %v1178_v24 = vsel %vm1177_vm1, %v1176_v21, %v1174_v55 }
 0x3cf   : > { %1184 = vst.msk [vmem:[%s347_s8] sm:$0x7] %vm1182_vm2, %v1178_v24 }
 0x3d0 PF: > { %p19_p8 = scmp.ge.s32.totalorder %s1570_s30, 4   ;;  %s1991_s26 = smov %s1490_s27 }
 0x3d1   : > { %s1992_s27 = smov %s1494_s28  ;;  %s1993_s28 = smov %s1580_s10 }
 0x3d2   : > { %s1994_s29 = smov %s1570_s30  ;;  %21 = sbr.rel (!%p19_p8) target bundleno = 6 (0x6), region = 96 }
 0x3d7   :  { %1205 = vsyncpa [#allocation4], 1 }
 0x3d8   :  { %1207 = vsyncpa [#allocation4 + $0x1], 1 }
 0x3d9   :  { %1208 = vsyncpa [#allocation6], 1 }

</bundles_post_ra>
